<compile_context>
chip_gen: v7x
topology: tpu7x:2x2x1
jax: 0.10.0
libtpu: 0.0.40
codegen_flags: <defaults>
</compile_context>

<pallas_src>
import functools

import jax
import jax.numpy as jnp
from jax.experimental import pallas as pl
from jax.experimental.pallas import tpu as pltpu

EPS = 1e-5              # torch.nn.BatchNorm2d default
ACT = jnp.bfloat16      # activation storage dtype in HBM


# ------------------------------------------------------------------ hardware config
@functools.lru_cache(maxsize=None)
def _hw_config():
    """Generation-dependent tiling / VMEM budget (v5e/v6e: 128 MiB VMEM, v7x: 64 MiB)."""
    try:
        cap = int(pltpu.get_tpu_info().vmem_capacity_bytes)
    except Exception:  # pragma: no cover - conservative default if query unavailable
        cap = 64 * 1024 * 1024
    big = cap >= 100 * 1024 * 1024
    return {
        "vmem_limit": (96 if big else 40) * 1024 * 1024,
        "tm_target": 512 if big else 256,
        "thw_target": 512 if big else 256,
        "resident_w_bytes": (16 if big else 10) * 1024 * 1024,
    }


def _compiler_params(sem):
    return pltpu.CompilerParams(dimension_semantics=sem,
                                vmem_limit_bytes=_hw_config()["vmem_limit"])


# ------------------------------------------------------------------ in-kernel math
def _erf(x):
    # TODO(synk): lax.erf is not guaranteed to lower in Mosaic; exact erf-GELU is reproduced
    # with the Abramowitz–Stegun 7.1.26 polynomial (max abs err ~1.5e-7).
    a1, a2, a3, a4, a5 = 0.254829592, -0.284496736, 1.421413741, -1.453152027, 1.061405429
    p = 0.3275911
    z = jnp.abs(x)
    # divide goes to the EUP slot (idle in these kernels) instead of the VALU
    t = pl.reciprocal(1.0 + p * z, approx=True)
    poly = ((((a5 * t + a4) * t + a3) * t + a2) * t + a1) * t
    e = 1.0 - poly * jnp.exp(-z * z)
    return jnp.where(x >= 0, e, -e)


def _gelu(x):
    # exact (erf-based) GELU matching torch.nn.GELU(approximate='none'); f32 math
    return 0.5 * x * (1.0 + _erf(x * 0.7071067811865476))


def _finalize_matmul(acc, b_ref, o_ref, st_ref):
    """+bias -> GELU -> bf16 store; per-channel (sum, sum_sq) of the *stored* (rounded)
    activation written as a single (1, 2, C) store."""
    h = _gelu(acc + b_ref[...])
    hb = h.astype(o_ref.dtype)
    o_ref[...] = hb
    hf = hb.astype(jnp.float32)
    s1 = jnp.sum(hf, axis=0, keepdims=True)
    s2 = jnp.sum(hf * hf, axis=0, keepdims=True)
    st_ref[...] = jnp.concatenate([s1, s2], axis=0)[None]


# ------------------------------------------------------------------ Pallas kernels
def matmul_gelu_stats_res_kernel(x_ref, w_ref, b_ref, o_ref, st_ref):
    """Resident-weight path: grid (mt,), whole K in one MXU pass, no accumulator."""
    acc = jnp.dot(x_ref[...], w_ref[...], preferred_element_type=jnp.float32)
    _finalize_matmul(acc, b_ref, o_ref, st_ref)


def matmul_gelu_stats_ktiled_kernel(x_ref, w_ref, b_ref, o_ref, st_ref, acc_ref):
    """Fallback: K tiled as inner grid axis with a VMEM f32 accumulator."""
    k = pl.program_id(1)

    @pl.when(k == 0)
    def _():
        acc_ref[...] = jnp.zeros_like(acc_ref)

    acc_ref[...] += jnp.dot(x_ref[...], w_ref[...], preferred_element_type=jnp.float32)

    @pl.when(k == pl.num_programs(1) - 1)
    def _():
        _finalize_matmul(acc_ref[...], b_ref, o_ref, st_ref)


def block_pw_res_kernel(hp_ref, hd_ref, scp_ref, scd_ref, w_ref, b_ref, o_ref, st_ref):
    """Fused ConvMixer-block pointwise path (resident weight): residual =
    BN_prev(h_prev) + BN_dw(h_dw), 1x1 conv as one MXU matmul, +bias, GELU, stats."""
    xres = hp_ref[...].astype(jnp.float32) * scp_ref[0:1, :] + scp_ref[1:2, :]
    xdw = hd_ref[...].astype(jnp.float32) * scd_ref[0:1, :] + scd_ref[1:2, :]
    z = (xres + xdw).astype(jnp.bfloat16)
    acc = jnp.dot(z, w_ref[...], preferred_element_type=jnp.float32)
    _finalize_matmul(acc, b_ref, o_ref, st_ref)


def block_pw_ktiled_kernel(hp_ref, hd_ref, scp_ref, scd_ref, w_ref, b_ref,
                           o_ref, st_ref, acc_ref):
    k = pl.program_id(1)

    @pl.when(k == 0)
    def _():
        acc_ref[...] = jnp.zeros_like(acc_ref)

    xres = hp_ref[...].astype(jnp.float32) * scp_ref[0:1, :] + scp_ref[1:2, :]
    xdw = hd_ref[...].astype(jnp.float32) * scd_ref[0:1, :] + scd_ref[1:2, :]
    acc_ref[...] += jnp.dot((xres + xdw).astype(jnp.bfloat16), w_ref[...],
                            preferred_element_type=jnp.float32)

    @pl.when(k == pl.num_programs(1) - 1)
    def _():
        _finalize_matmul(acc_ref[...], b_ref, o_ref, st_ref)


def depthwise_gelu_stats_kernel(h_ref, sc_ref, w_ref, b_ref, o_ref, st_ref, pad_ref,
                                *, ksize, H, W):
    """Per-(image, channel-tile) depthwise KxK conv with 'same' padding via a bf16 VMEM
    scratch.  Applies the previous layer's BN (scale/shift) on the fly while loading the
    input, then bias + GELU, and emits per-channel (sum, sum_sq) of the stored output."""
    p = ksize // 2
    tc = h_ref.shape[-1]

    # Zero only the p-wide halo; the interior is overwritten by the BN'd input below.
    # (Scratch contents cannot be assumed across grid steps under megacore "parallel".)
    zrow = jnp.zeros((1, p, W + 2 * p, tc), jnp.bfloat16)
    zcol = jnp.zeros((1, H + 2 * p, p, tc), jnp.bfloat16)
    pad_ref[:, 0:p, :, :] = zrow
    pad_ref[:, p + H:2 * p + H, :, :] = zrow
    pad_ref[:, :, 0:p, :] = zcol
    pad_ref[:, :, p + W:2 * p + W, :] = zcol

    x = h_ref[...].astype(jnp.float32) * sc_ref[0:1, :] + sc_ref[1:2, :]   # BN of prev layer
    pad_ref[:, p:p + H, p:p + W, :] = x.astype(jnp.bfloat16)

    acc = jnp.zeros((1, H, W, tc), jnp.float32)
    # Only k unaligned sublane (dx) slices; the dy slices below run along the H-major axis
    # of an already-loaded value and need no relayout.
    for dx in range(ksize):
        col = pad_ref[:, :, dx:dx + W, :].astype(jnp.float32)   # (1, H+2p, W, tc)
        for dy in range(ksize):
            i = dy * ksize + dx
            acc = acc + col[:, dy:dy + H, :, :] * w_ref[i:i + 1, :]

    hd = _gelu(acc + b_ref[...])
    hdb = hd.astype(o_ref.dtype)
    o_ref[...] = hdb
    hf = hdb.astype(jnp.float32).reshape(H * W, tc)
    s1 = jnp.sum(hf, axis=0, keepdims=True)
    s2 = jnp.sum(hf * hf, axis=0, keepdims=True)
    st_ref[...] = jnp.concatenate([s1, s2], axis=0)[None]


def head_kernel(h_ref, sc_ref, w_ref, b_ref, o_ref, acc_ref, *, inv_hw):
    """BN-apply + global average pool (accumulated across spatial grid tiles) + Linear,
    batch-tiled so VMEM usage is independent of the full batch size."""
    s = pl.program_id(1)

    @pl.when(s == 0)
    def _():
        acc_ref[...] = jnp.zeros_like(acc_ref)

    x = h_ref[...].astype(jnp.float32) * sc_ref[0:1, :] + sc_ref[1:2, :]
    acc_ref[...] += jnp.sum(x, axis=1)

    @pl.when(s == pl.num_programs(1) - 1)
    def _():
        pooled = (acc_ref[...] * inv_hw).astype(jnp.bfloat16)
        o_ref[...] = jnp.dot(pooled, w_ref[...],
                             preferred_element_type=jnp.float32) + b_ref[...]


# ------------------------------------------------------------------ tiling helpers
def _round_up(v, m):
    return ((v + m - 1) // m) * m


def _pick_tile(total, target, aligns=(256, 128, 8)):
    """Largest divisor of `total` <= target that is a multiple of one of `aligns`
    (tried in order); falls back to the full extent (always a legal block)."""
    if total <= target:
        return total
    for align in aligns:
        t = (target // align) * align
        while t >= align:
            if total % t == 0:
                return t
            t -= align
    # TODO(synk): awkward `total` with no aligned divisor <= target falls back to the full
    # extent, which may exceed the VMEM budget for pathological shapes.
    return total


def _pick_ktile(K):
    if K <= 512:
        return K
    for t in (512, 256, 128):
        if K % t == 0:
            return t
    return K


def _pick_ctile(Cp):
    if Cp <= 256:
        return Cp
    return 256 if Cp % 256 == 0 else 128


def _pick_batch_tile(N):
    if N <= 8:
        return N
    return 8 if N % 8 == 0 else N


# ------------------------------------------------------------------ pallas_call wrappers
def matmul_gelu_stats(x_bf16, w_bf16, b):
    M, K = x_bf16.shape
    Cp = w_bf16.shape[1]
    cfg = _hw_config()
    tm = _pick_tile(M, cfg["tm_target"])
    mt = M // tm

    if K * Cp * 2 <= cfg["resident_w_bytes"]:
        # weight block index constant over the whole grid -> one DMA, no accumulator
        return pl.pallas_call(
            matmul_gelu_stats_res_kernel,
            out_shape=(jax.ShapeDtypeStruct((M, Cp), ACT),
                       jax.ShapeDtypeStruct((mt, 2, Cp), jnp.float32)),
            grid=(mt,),
            in_specs=[pl.BlockSpec((tm, K), lambda m: (m, 0)),
                      pl.BlockSpec((K, Cp), lambda m: (0, 0)),
                      pl.BlockSpec((1, Cp), lambda m: (0, 0))],
            out_specs=(pl.BlockSpec((tm, Cp), lambda m: (m, 0)),
                       pl.BlockSpec((1, 2, Cp), lambda m: (m, 0, 0))),
            compiler_params=_compiler_params(("parallel",)),
        )(x_bf16, w_bf16, b)

    tk = _pick_ktile(K)
    kt = K // tk
    return pl.pallas_call(
        matmul_gelu_stats_ktiled_kernel,
        out_shape=(jax.ShapeDtypeStruct((M, Cp), ACT),
                   jax.ShapeDtypeStruct((mt, 2, Cp), jnp.float32)),
        grid=(mt, kt),
        in_specs=[pl.BlockSpec((tm, tk), lambda m, k: (m, k)),
                  pl.BlockSpec((tk, Cp), lambda m, k: (k, 0)),
                  pl.BlockSpec((1, Cp), lambda m, k: (0, 0))],
        out_specs=(pl.BlockSpec((tm, Cp), lambda m, k: (m, 0)),
                   pl.BlockSpec((1, 2, Cp), lambda m, k: (m, 0, 0))),
        scratch_shapes=[pltpu.VMEM((tm, Cp), jnp.float32)],
        compiler_params=_compiler_params(("parallel", "arbitrary")),
    )(x_bf16, w_bf16, b)


def block_pointwise(h_prev, hd, sc_prev, sc_d, w_bf16, b):
    M, K = h_prev.shape
    Cp = w_bf16.shape[1]
    cfg = _hw_config()
    tm = _pick_tile(M, cfg["tm_target"])
    mt = M // tm

    if K * Cp * 2 <= cfg["resident_w_bytes"]:
        return pl.pallas_call(
            block_pw_res_kernel,
            out_shape=(jax.ShapeDtypeStruct((M, Cp), ACT),
                       jax.ShapeDtypeStruct((mt, 2, Cp), jnp.float32)),
            grid=(mt,),
            in_specs=[pl.BlockSpec((tm, K), lambda m: (m, 0)),
                      pl.BlockSpec((tm, K), lambda m: (m, 0)),
                      pl.BlockSpec((2, K), lambda m: (0, 0)),
                      pl.BlockSpec((2, K), lambda m: (0, 0)),
                      pl.BlockSpec((K, Cp), lambda m: (0, 0)),
                      pl.BlockSpec((1, Cp), lambda m: (0, 0))],
            out_specs=(pl.BlockSpec((tm, Cp), lambda m: (m, 0)),
                       pl.BlockSpec((1, 2, Cp), lambda m: (m, 0, 0))),
            compiler_params=_compiler_params(("parallel",)),
        )(h_prev, hd, sc_prev, sc_d, w_bf16, b)

    tk = _pick_ktile(K)
    kt = K // tk
    return pl.pallas_call(
        block_pw_ktiled_kernel,
        out_shape=(jax.ShapeDtypeStruct((M, Cp), ACT),
                   jax.ShapeDtypeStruct((mt, 2, Cp), jnp.float32)),
        grid=(mt, kt),
        in_specs=[pl.BlockSpec((tm, tk), lambda m, k: (m, k)),
                  pl.BlockSpec((tm, tk), lambda m, k: (m, k)),
                  pl.BlockSpec((2, tk), lambda m, k: (0, k)),
                  pl.BlockSpec((2, tk), lambda m, k: (0, k)),
                  pl.BlockSpec((tk, Cp), lambda m, k: (k, 0)),
                  pl.BlockSpec((1, Cp), lambda m, k: (0, 0))],
        out_specs=(pl.BlockSpec((tm, Cp), lambda m, k: (m, 0)),
                   pl.BlockSpec((1, 2, Cp), lambda m, k: (m, 0, 0))),
        scratch_shapes=[pltpu.VMEM((tm, Cp), jnp.float32)],
        compiler_params=_compiler_params(("parallel", "arbitrary")),
    )(h_prev, hd, sc_prev, sc_d, w_bf16, b)


def depthwise_gelu_stats(h_nhwc, sc_prev, dw_w, dw_b, *, ksize):
    N, H, W, Cp = h_nhwc.shape
    p = ksize // 2
    tc = _pick_ctile(Cp)
    nc = Cp // tc
    kern = functools.partial(depthwise_gelu_stats_kernel, ksize=ksize, H=H, W=W)
    return pl.pallas_call(
        kern,
        out_shape=(jax.ShapeDtypeStruct((N, H, W, Cp), ACT),
                   jax.ShapeDtypeStruct((N, 2, Cp), jnp.float32)),
        grid=(N, nc),
        in_specs=[pl.BlockSpec((1, H, W, tc), lambda n, c: (n, 0, 0, c)),
                  pl.BlockSpec((2, tc), lambda n, c: (0, c)),
                  pl.BlockSpec((ksize * ksize, tc), lambda n, c: (0, c)),
                  pl.BlockSpec((1, tc), lambda n, c: (0, c))],
        out_specs=(pl.BlockSpec((1, H, W, tc), lambda n, c: (n, 0, 0, c)),
                   pl.BlockSpec((1, 2, tc), lambda n, c: (n, 0, c))),
        scratch_shapes=[pltpu.VMEM((1, H + 2 * p, W + 2 * p, tc), jnp.bfloat16)],
        compiler_params=_compiler_params(("parallel", "parallel")),
    )(h_nhwc, sc_prev, dw_w, dw_b)


def head_call(h_nhw, sc, w_bf16, b):
    N, HW, Cp = h_nhw.shape
    NCp = w_bf16.shape[1]
    cfg = _hw_config()
    tn = _pick_batch_tile(N)
    thw = _pick_tile(HW, cfg["thw_target"], aligns=(8,))
    nb, st = N // tn, HW // thw
    kern = functools.partial(head_kernel, inv_hw=1.0 / HW)
    return pl.pallas_call(
        kern,
        out_shape=jax.ShapeDtypeStruct((N, NCp), jnp.float32),
        grid=(nb, st),
        in_specs=[pl.BlockSpec((tn, thw, Cp), lambda bi, s: (bi, s, 0)),
                  pl.BlockSpec((2, Cp), lambda bi, s: (0, 0)),
                  pl.BlockSpec((Cp, NCp), lambda bi, s: (0, 0)),
                  pl.BlockSpec((1, NCp), lambda bi, s: (0, 0))],
        out_specs=pl.BlockSpec((tn, NCp), lambda bi, s: (bi, 0)),
        scratch_shapes=[pltpu.VMEM((tn, Cp), jnp.float32)],
        compiler_params=_compiler_params(("parallel", "arbitrary")),
    )(h_nhw, sc, w_bf16, b)


# ------------------------------------------------------------------ glue
def extract_patches(x_nchw, p):
    # non-overlapping patches -> rows of (Cin*p*p); row layout (ci, ky, kx), so
    # patch_w[(ci*p+ky)*p+kx, c] corresponds to torch conv weight[c, ci, ky, kx]
    N, Cin, H, W = x_nchw.shape
    Hp, Wp = H // p, W // p
    xp = x_nchw.reshape(N, Cin, Hp, p, Wp, p)
    xp = xp.transpose(0, 2, 4, 1, 3, 5)
    return xp.reshape(N * Hp * Wp, Cin * p * p)


def _pad_last(a, to):
    return jnp.pad(a, [(0, 0)] * (a.ndim - 1) + [(0, to - a.shape[-1])])


def _finish_stats(stats, count, gamma_p, beta_p):
    """Per-tile per-channel (sum, sum_sq) -> BatchNorm (scale, shift) in f32 (training-mode,
    biased variance, eps=1e-5). Zero-padded channels have gamma=0 -> scale=shift=0."""
    # TODO(synk): fold this tiny reduction into the consuming kernel via scalar prefetch to
    # remove the per-block XLA launch bubbles.
    s = jnp.sum(stats[:, 0, :], axis=0)
    ss = jnp.sum(stats[:, 1, :], axis=0)
    mean = s / count
    var = jnp.maximum(ss / count - mean * mean, 0.0)
    scale = gamma_p.reshape(-1) * jax.lax.rsqrt(var + EPS)
    shift = beta_p.reshape(-1) - mean * scale
    return jnp.stack([scale, shift], axis=0)            # (2, Cp)


# ------------------------------------------------------------------ model
def init_params(key, dim, depth, ksize, psize, n_classes, in_ch=3):
    keys = jax.random.split(key, 4 + 4 * depth)
    params = {
        "patch_w": jax.random.normal(keys[0], (in_ch * psize * psize, dim), jnp.float32) * 0.05,
        "patch_b": jax.random.normal(keys[1], (1, dim), jnp.float32) * 0.05,
        "patch_g": jnp.ones((1, dim), jnp.float32),
        "patch_beta": jnp.zeros((1, dim), jnp.float32),
        "blocks": [],
    }
    i = 2
    for _ in range(depth):
        params["blocks"].append({
            "dw_w": jax.random.normal(keys[i], (ksize * ksize, dim), jnp.float32) * 0.1,
            "dw_b": jax.random.normal(keys[i + 1], (1, dim), jnp.float32) * 0.05,
            "bn1_g": jnp.ones((1, dim), jnp.float32),
            "bn1_b": jnp.zeros((1, dim), jnp.float32),
            "pw_w": jax.random.normal(keys[i + 2], (dim, dim), jnp.float32) * 0.05,
            "pw_b": jax.random.normal(keys[i + 3], (1, dim), jnp.float32) * 0.05,
            "bn2_g": jnp.ones((1, dim), jnp.float32),
            "bn2_b": jnp.zeros((1, dim), jnp.float32),
        })
        i += 4
    params["head_w"] = jax.random.normal(keys[i], (dim, n_classes), jnp.float32) * 0.05
    params["head_b"] = jax.random.normal(keys[i + 1], (1, n_classes), jnp.float32) * 0.05
    return params


def convmixer_forward(x_nchw, params, *, kernel_size, patch_size):
    assert kernel_size % 2 == 1, "padding='same' path implemented for odd kernels"
    N, _, H, W = x_nchw.shape
    Hp, Wp = H // patch_size, W // patch_size
    M = N * Hp * Wp
    dim = params["patch_w"].shape[1]
    n_classes = params["head_w"].shape[1]
    Cp = _round_up(dim, 128)          # lane-dense channel dim
    NCp = _round_up(n_classes, 128)   # lane-dense class dim (sliced off at the end)

    # ---- patch embedding: Conv2d(3, dim, k=p, stride=p) as matmul + GELU (+ deferred BN)
    patches = extract_patches(x_nchw, patch_size)
    K = patches.shape[1]
    Kp = _round_up(K, 128)
    patches = jnp.pad(patches, ((0, 0), (0, Kp - K))).astype(jnp.bfloat16)
    w = jnp.pad(params["patch_w"], ((0, Kp - K), (0, Cp - dim))).astype(jnp.bfloat16)
    h, stats = matmul_gelu_stats(patches, w, _pad_last(params["patch_b"], Cp))
    sc = _finish_stats(stats, M, _pad_last(params["patch_g"], Cp),
                       _pad_last(params["patch_beta"], Cp))

    # ---- ConvMixer blocks
    for blk in params["blocks"]:
        hd, dstats = depthwise_gelu_stats(
            h.reshape(N, Hp, Wp, Cp), sc,
            _pad_last(blk["dw_w"], Cp), _pad_last(blk["dw_b"], Cp),
            ksize=kernel_size)
        scd = _finish_stats(dstats, M, _pad_last(blk["bn1_g"], Cp),
                            _pad_last(blk["bn1_b"], Cp))
        pw_w = jnp.pad(blk["pw_w"], ((0, Cp - dim), (0, Cp - dim))).astype(jnp.bfloat16)
        h, pstats = block_pointwise(h, hd.reshape(M, Cp), sc, scd,
                                    pw_w, _pad_last(blk["pw_b"], Cp))
        sc = _finish_stats(pstats, M, _pad_last(blk["bn2_g"], Cp),
                           _pad_last(blk["bn2_b"], Cp))

    # ---- head: AdaptiveAvgPool2d((1,1)) + Flatten + Linear (BN of last block applied inside)
    head_w = jnp.pad(params["head_w"],
                     ((0, Cp - dim), (0, NCp - n_classes))).astype(jnp.bfloat16)
    head_b = _pad_last(params["head_b"], NCp)
    logits = head_call(h.reshape(N, Hp * Wp, Cp), sc, head_w, head_b)
    return logits[:, :n_classes]


if __name__ == "__main__":
    dim, depth, kernel_size, patch_size, n_classes = 32, 2, 3, 7, 16
    key = jax.random.PRNGKey(0)
    kp, kx = jax.random.split(key)
    params = init_params(kp, dim, depth, kernel_size, patch_size, n_classes)
    x = jax.random.normal(kx, (2, 3, 28, 28), jnp.float32)   # NCHW, as in PyTorch

    fwd = jax.jit(functools.partial(convmixer_forward,
                                    kernel_size=kernel_size, patch_size=patch_size))
    out = fwd(x, params)
    jax.block_until_ready(out)
    assert out.shape == (2, n_classes) and out.dtype == jnp.float32
    print("KERNEL_OK")
</pallas_src>

<mosaic_0001>
module attributes {stable_mosaic.version = 11 : i64} {
  func.func @depthwise_gelu_stats_kernel(%arg0: i32, %arg1: i32, %arg2: memref<1x4x4x128xbf16, #tpu.memory_space<vmem>>, %arg3: memref<2x128xf32, #tpu.memory_space<vmem>>, %arg4: memref<9x128xf32, #tpu.memory_space<vmem>>, %arg5: memref<1x128xf32, #tpu.memory_space<vmem>>, %arg6: memref<1x4x4x128xbf16, #tpu.memory_space<vmem>>, %arg7: memref<1x2x128xf32, #tpu.memory_space<vmem>>, %arg8: memref<1x6x6x128xbf16, #tpu.memory_space<vmem>>) attributes {dimension_semantics = [#tpu.dimension_semantics<parallel>, #tpu.dimension_semantics<parallel>], iteration_bounds = array<i64: 2, 1>, scalar_prefetch = 0 : i64, scratch_operands = 1 : i64, tpu.core_type = #tpu.core_type<tc>, window_params = [{transform_indices = @transform_0, window_bounds = array<i64: 1, 4, 4, 128>}, {transform_indices = @transform_1, window_bounds = array<i64: 2, 128>}, {transform_indices = @transform_2, window_bounds = array<i64: 9, 128>}, {transform_indices = @transform_3, window_bounds = array<i64: 1, 128>}, {transform_indices = @transform_4, window_bounds = array<i64: 1, 4, 4, 128>}, {transform_indices = @transform_5, window_bounds = array<i64: 1, 2, 128>}]} {
    %cst = arith.constant 0.000000e+00 : bf16
    %0 = vector.broadcast %cst : bf16 to vector<1x1x6x128xbf16>
    %cst_0 = arith.constant 0.000000e+00 : bf16
    %1 = vector.broadcast %cst_0 : bf16 to vector<1x6x1x128xbf16>
    %c0 = arith.constant 0 : index
    %c0_1 = arith.constant 0 : index
    %c0_2 = arith.constant 0 : index
    %c0_3 = arith.constant 0 : index
    %2 = vector.load %arg8[%c0, %c0_1, %c0_2, %c0_3] : memref<1x6x6x128xbf16, #tpu.memory_space<vmem>>, vector<1x1x6x128xbf16>
    tpu.vector_store %arg8[%c0, %c0_1, %c0_2, %c0_3], %0 {strides = array<i32>} : memref<1x6x6x128xbf16, #tpu.memory_space<vmem>>, vector<1x1x6x128xbf16>,
    %c0_4 = arith.constant 0 : index
    %c5 = arith.constant 5 : index
    %c0_5 = arith.constant 0 : index
    %c0_6 = arith.constant 0 : index
    %3 = vector.load %arg8[%c0_4, %c5, %c0_5, %c0_6] : memref<1x6x6x128xbf16, #tpu.memory_space<vmem>>, vector<1x1x6x128xbf16>
    tpu.vector_store %arg8[%c0_4, %c5, %c0_5, %c0_6], %0 {strides = array<i32>} : memref<1x6x6x128xbf16, #tpu.memory_space<vmem>>, vector<1x1x6x128xbf16>,
    %c0_7 = arith.constant 0 : index
    %c0_8 = arith.constant 0 : index
    %c0_9 = arith.constant 0 : index
    %c0_10 = arith.constant 0 : index
    %4 = vector.load %arg8[%c0_7, %c0_8, %c0_9, %c0_10] : memref<1x6x6x128xbf16, #tpu.memory_space<vmem>>, vector<1x6x1x128xbf16>
    tpu.vector_store %arg8[%c0_7, %c0_8, %c0_9, %c0_10], %1 {strides = array<i32>} : memref<1x6x6x128xbf16, #tpu.memory_space<vmem>>, vector<1x6x1x128xbf16>,
    %c0_11 = arith.constant 0 : index
    %c0_12 = arith.constant 0 : index
    %c5_13 = arith.constant 5 : index
    %c0_14 = arith.constant 0 : index
    %5 = vector.load %arg8[%c0_11, %c0_12, %c5_13, %c0_14] : memref<1x6x6x128xbf16, #tpu.memory_space<vmem>>, vector<1x6x1x128xbf16>
    tpu.vector_store %arg8[%c0_11, %c0_12, %c5_13, %c0_14], %1 {strides = array<i32>} : memref<1x6x6x128xbf16, #tpu.memory_space<vmem>>, vector<1x6x1x128xbf16>,
    %c0_15 = arith.constant 0 : index
    %c0_16 = arith.constant 0 : index
    %c0_17 = arith.constant 0 : index
    %c0_18 = arith.constant 0 : index
    %6 = vector.load %arg2[%c0_15, %c0_16, %c0_17, %c0_18] : memref<1x4x4x128xbf16, #tpu.memory_space<vmem>>, vector<1x4x4x128xbf16>
    %7 = arith.extf %6 : vector<1x4x4x128xbf16> to vector<1x4x4x128xf32>
    %c0_19 = arith.constant 0 : index
    %c0_20 = arith.constant 0 : index
    %8 = vector.load %arg3[%c0_19, %c0_20] : memref<2x128xf32, #tpu.memory_space<vmem>>, vector<1x128xf32>
    %9 = vector.shape_cast %8 : vector<1x128xf32> to vector<1x1x1x128xf32>
    %10 = vector.broadcast %9 : vector<1x1x1x128xf32> to vector<1x4x4x128xf32>
    %11 = arith.mulf %7, %10 : vector<1x4x4x128xf32>
    %c1 = arith.constant 1 : index
    %c0_21 = arith.constant 0 : index
    %12 = vector.load %arg3[%c1, %c0_21] : memref<2x128xf32, #tpu.memory_space<vmem>>, vector<1x128xf32>
    %13 = vector.shape_cast %12 : vector<1x128xf32> to vector<1x1x1x128xf32>
    %14 = vector.broadcast %13 : vector<1x1x1x128xf32> to vector<1x4x4x128xf32>
    %15 = arith.addf %11, %14 : vector<1x4x4x128xf32>
    %16 = arith.truncf %15 : vector<1x4x4x128xf32> to vector<1x4x4x128xbf16>
    %c0_22 = arith.constant 0 : index
    %c1_23 = arith.constant 1 : index
    %c1_24 = arith.constant 1 : index
    %c0_25 = arith.constant 0 : index
    %17 = vector.load %arg8[%c0_22, %c1_23, %c1_24, %c0_25] : memref<1x6x6x128xbf16, #tpu.memory_space<vmem>>, vector<1x4x4x128xbf16>
    tpu.vector_store %arg8[%c0_22, %c1_23, %c1_24, %c0_25], %16 {strides = array<i32>} : memref<1x6x6x128xbf16, #tpu.memory_space<vmem>>, vector<1x4x4x128xbf16>,
    %cst_26 = arith.constant 0.000000e+00 : f32
    %18 = vector.broadcast %cst_26 : f32 to vector<1x4x4x128xf32>
    %c0_27 = arith.constant 0 : index
    %c0_28 = arith.constant 0 : index
    %c0_29 = arith.constant 0 : index
    %c0_30 = arith.constant 0 : index
    %19 = vector.load %arg8[%c0_27, %c0_28, %c0_29, %c0_30] : memref<1x6x6x128xbf16, #tpu.memory_space<vmem>>, vector<1x6x4x128xbf16>
    %20 = arith.extf %19 : vector<1x6x4x128xbf16> to vector<1x6x4x128xf32>
    %21 = vector.extract_strided_slice %20 {offsets = [0, 0, 0, 0], sizes = [1, 4, 4, 128], strides = [1, 1, 1, 1]} : vector<1x6x4x128xf32> to vector<1x4x4x128xf32>
    %c0_31 = arith.constant 0 : index
    %c0_32 = arith.constant 0 : index
    %22 = vector.load %arg4[%c0_31, %c0_32] : memref<9x128xf32, #tpu.memory_space<vmem>>, vector<1x128xf32>
    %23 = vector.shape_cast %22 : vector<1x128xf32> to vector<1x1x1x128xf32>
    %24 = vector.broadcast %23 : vector<1x1x1x128xf32> to vector<1x4x4x128xf32>
    %25 = arith.mulf %21, %24 : vector<1x4x4x128xf32>
    %26 = arith.addf %18, %25 : vector<1x4x4x128xf32>
    %27 = vector.extract_strided_slice %20 {offsets = [0, 1, 0, 0], sizes = [1, 4, 4, 128], strides = [1, 1, 1, 1]} : vector<1x6x4x128xf32> to vector<1x4x4x128xf32>
    %c3 = arith.constant 3 : index
    %c0_33 = arith.constant 0 : index
    %28 = vector.load %arg4[%c3, %c0_33] : memref<9x128xf32, #tpu.memory_space<vmem>>, vector<1x128xf32>
    %29 = vector.shape_cast %28 : vector<1x128xf32> to vector<1x1x1x128xf32>
    %30 = vector.broadcast %29 : vector<1x1x1x128xf32> to vector<1x4x4x128xf32>
    %31 = arith.mulf %27, %30 : vector<1x4x4x128xf32>
    %32 = arith.addf %26, %31 : vector<1x4x4x128xf32>
    %33 = vector.extract_strided_slice %20 {offsets = [0, 2, 0, 0], sizes = [1, 4, 4, 128], strides = [1, 1, 1, 1]} : vector<1x6x4x128xf32> to vector<1x4x4x128xf32>
    %c6 = arith.constant 6 : index
    %c0_34 = arith.constant 0 : index
    %34 = vector.load %arg4[%c6, %c0_34] : memref<9x128xf32, #tpu.memory_space<vmem>>, vector<1x128xf32>
    %35 = vector.shape_cast %34 : vector<1x128xf32> to vector<1x1x1x128xf32>
    %36 = vector.broadcast %35 : vector<1x1x1x128xf32> to vector<1x4x4x128xf32>
    %37 = arith.mulf %33, %36 : vector<1x4x4x128xf32>
    %38 = arith.addf %32, %37 : vector<1x4x4x128xf32>
    %c0_35 = arith.constant 0 : index
    %c0_36 = arith.constant 0 : index
    %c1_37 = arith.constant 1 : index
    %c0_38 = arith.constant 0 : index
    %39 = vector.load %arg8[%c0_35, %c0_36, %c1_37, %c0_38] : memref<1x6x6x128xbf16, #tpu.memory_space<vmem>>, vector<1x6x4x128xbf16>
    %40 = arith.extf %39 : vector<1x6x4x128xbf16> to vector<1x6x4x128xf32>
    %41 = vector.extract_strided_slice %40 {offsets = [0, 0, 0, 0], sizes = [1, 4, 4, 128], strides = [1, 1, 1, 1]} : vector<1x6x4x128xf32> to vector<1x4x4x128xf32>
    %c1_39 = arith.constant 1 : index
    %c0_40 = arith.constant 0 : index
    %42 = vector.load %arg4[%c1_39, %c0_40] : memref<9x128xf32, #tpu.memory_space<vmem>>, vector<1x128xf32>
    %43 = vector.shape_cast %42 : vector<1x128xf32> to vector<1x1x1x128xf32>
    %44 = vector.broadcast %43 : vector<1x1x1x128xf32> to vector<1x4x4x128xf32>
    %45 = arith.mulf %41, %44 : vector<1x4x4x128xf32>
    %46 = arith.addf %38, %45 : vector<1x4x4x128xf32>
    %47 = vector.extract_strided_slice %40 {offsets = [0, 1, 0, 0], sizes = [1, 4, 4, 128], strides = [1, 1, 1, 1]} : vector<1x6x4x128xf32> to vector<1x4x4x128xf32>
    %c4 = arith.constant 4 : index
    %c0_41 = arith.constant 0 : index
    %48 = vector.load %arg4[%c4, %c0_41] : memref<9x128xf32, #tpu.memory_space<vmem>>, vector<1x128xf32>
    %49 = vector.shape_cast %48 : vector<1x128xf32> to vector<1x1x1x128xf32>
    %50 = vector.broadcast %49 : vector<1x1x1x128xf32> to vector<1x4x4x128xf32>
    %51 = arith.mulf %47, %50 : vector<1x4x4x128xf32>
    %52 = arith.addf %46, %51 : vector<1x4x4x128xf32>
    %53 = vector.extract_strided_slice %40 {offsets = [0, 2, 0, 0], sizes = [1, 4, 4, 128], strides = [1, 1, 1, 1]} : vector<1x6x4x128xf32> to vector<1x4x4x128xf32>
    %c7 = arith.constant 7 : index
    %c0_42 = arith.constant 0 : index
    %54 = vector.load %arg4[%c7, %c0_42] : memref<9x128xf32, #tpu.memory_space<vmem>>, vector<1x128xf32>
    %55 = vector.shape_cast %54 : vector<1x128xf32> to vector<1x1x1x128xf32>
    %56 = vector.broadcast %55 : vector<1x1x1x128xf32> to vector<1x4x4x128xf32>
    %57 = arith.mulf %53, %56 : vector<1x4x4x128xf32>
    %58 = arith.addf %52, %57 : vector<1x4x4x128xf32>
    %c0_43 = arith.constant 0 : index
    %c0_44 = arith.constant 0 : index
    %c2 = arith.constant 2 : index
    %c0_45 = arith.constant 0 : index
    %59 = vector.load %arg8[%c0_43, %c0_44, %c2, %c0_45] : memref<1x6x6x128xbf16, #tpu.memory_space<vmem>>, vector<1x6x4x128xbf16>
    %60 = arith.extf %59 : vector<1x6x4x128xbf16> to vector<1x6x4x128xf32>
    %61 = vector.extract_strided_slice %60 {offsets = [0, 0, 0, 0], sizes = [1, 4, 4, 128], strides = [1, 1, 1, 1]} : vector<1x6x4x128xf32> to vector<1x4x4x128xf32>
    %c2_46 = arith.constant 2 : index
    %c0_47 = arith.constant 0 : index
    %62 = vector.load %arg4[%c2_46, %c0_47] : memref<9x128xf32, #tpu.memory_space<vmem>>, vector<1x128xf32>
    %63 = vector.shape_cast %62 : vector<1x128xf32> to vector<1x1x1x128xf32>
    %64 = vector.broadcast %63 : vector<1x1x1x128xf32> to vector<1x4x4x128xf32>
    %65 = arith.mulf %61, %64 : vector<1x4x4x128xf32>
    %66 = arith.addf %58, %65 : vector<1x4x4x128xf32>
    %67 = vector.extract_strided_slice %60 {offsets = [0, 1, 0, 0], sizes = [1, 4, 4, 128], strides = [1, 1, 1, 1]} : vector<1x6x4x128xf32> to vector<1x4x4x128xf32>
    %c5_48 = arith.constant 5 : index
    %c0_49 = arith.constant 0 : index
    %68 = vector.load %arg4[%c5_48, %c0_49] : memref<9x128xf32, #tpu.memory_space<vmem>>, vector<1x128xf32>
    %69 = vector.shape_cast %68 : vector<1x128xf32> to vector<1x1x1x128xf32>
    %70 = vector.broadcast %69 : vector<1x1x1x128xf32> to vector<1x4x4x128xf32>
    %71 = arith.mulf %67, %70 : vector<1x4x4x128xf32>
    %72 = arith.addf %66, %71 : vector<1x4x4x128xf32>
    %73 = vector.extract_strided_slice %60 {offsets = [0, 2, 0, 0], sizes = [1, 4, 4, 128], strides = [1, 1, 1, 1]} : vector<1x6x4x128xf32> to vector<1x4x4x128xf32>
    %c8 = arith.constant 8 : index
    %c0_50 = arith.constant 0 : index
    %74 = vector.load %arg4[%c8, %c0_50] : memref<9x128xf32, #tpu.memory_space<vmem>>, vector<1x128xf32>
    %75 = vector.shape_cast %74 : vector<1x128xf32> to vector<1x1x1x128xf32>
    %76 = vector.broadcast %75 : vector<1x1x1x128xf32> to vector<1x4x4x128xf32>
    %77 = arith.mulf %73, %76 : vector<1x4x4x128xf32>
    %78 = arith.addf %72, %77 : vector<1x4x4x128xf32>
    %c0_51 = arith.constant 0 : index
    %c0_52 = arith.constant 0 : index
    %79 = vector.load %arg5[%c0_51, %c0_52] : memref<1x128xf32, #tpu.memory_space<vmem>>, vector<1x128xf32>
    %80 = vector.shape_cast %79 : vector<1x128xf32> to vector<1x1x1x128xf32>
    %81 = vector.broadcast %80 : vector<1x1x1x128xf32> to vector<1x4x4x128xf32>
    %82 = arith.addf %78, %81 : vector<1x4x4x128xf32>
    %cst_53 = arith.constant 5.000000e-01 : f32
    %83 = vector.broadcast %cst_53 : f32 to vector<1x4x4x128xf32>
    %84 = arith.mulf %83, %82 : vector<1x4x4x128xf32>
    %cst_54 = arith.constant 0.707106769 : f32
    %85 = vector.broadcast %cst_54 : f32 to vector<1x4x4x128xf32>
    %86 = arith.mulf %82, %85 : vector<1x4x4x128xf32>
    %87 = math.absf %86 : vector<1x4x4x128xf32>
    %cst_55 = arith.constant 0.327591091 : f32
    %88 = vector.broadcast %cst_55 : f32 to vector<1x4x4x128xf32>
    %89 = arith.mulf %88, %87 : vector<1x4x4x128xf32>
    %cst_56 = arith.constant 1.000000e+00 : f32
    %90 = vector.broadcast %cst_56 : f32 to vector<1x4x4x128xf32>
    %91 = arith.addf %90, %89 : vector<1x4x4x128xf32>
    %92 = tpu.reciprocal %91 {approx = true} : vector<1x4x4x128xf32> -> vector<1x4x4x128xf32>
    %cst_57 = arith.constant 1.06140542 : f32
    %93 = vector.broadcast %cst_57 : f32 to vector<1x4x4x128xf32>
    %94 = arith.mulf %93, %92 : vector<1x4x4x128xf32>
    %cst_58 = arith.constant -1.45315206 : f32
    %95 = vector.broadcast %cst_58 : f32 to vector<1x4x4x128xf32>
    %96 = arith.addf %94, %95 : vector<1x4x4x128xf32>
    %97 = arith.mulf %96, %92 : vector<1x4x4x128xf32>
    %cst_59 = arith.constant 1.42141378 : f32
    %98 = vector.broadcast %cst_59 : f32 to vector<1x4x4x128xf32>
    %99 = arith.addf %97, %98 : vector<1x4x4x128xf32>
    %100 = arith.mulf %99, %92 : vector<1x4x4x128xf32>
    %cst_60 = arith.constant -0.284496725 : f32
    %101 = vector.broadcast %cst_60 : f32 to vector<1x4x4x128xf32>
    %102 = arith.addf %100, %101 : vector<1x4x4x128xf32>
    %103 = arith.mulf %102, %92 : vector<1x4x4x128xf32>
    %cst_61 = arith.constant 0.254829586 : f32
    %104 = vector.broadcast %cst_61 : f32 to vector<1x4x4x128xf32>
    %105 = arith.addf %103, %104 : vector<1x4x4x128xf32>
    %106 = arith.mulf %105, %92 : vector<1x4x4x128xf32>
    %cst_62 = arith.constant 0.000000e+00 : f32
    %107 = vector.broadcast %cst_62 : f32 to vector<1x4x4x128xf32>
    %108 = arith.subf %107, %87 : vector<1x4x4x128xf32>
    %109 = arith.mulf %108, %87 : vector<1x4x4x128xf32>
    %110 = math.exp %109 : vector<1x4x4x128xf32>
    %111 = arith.mulf %106, %110 : vector<1x4x4x128xf32>
    %cst_63 = arith.constant 1.000000e+00 : f32
    %112 = vector.broadcast %cst_63 : f32 to vector<1x4x4x128xf32>
    %113 = arith.subf %112, %111 : vector<1x4x4x128xf32>
    %cst_64 = arith.constant 0.000000e+00 : f32
    %114 = vector.broadcast %cst_64 : f32 to vector<1x4x4x128xf32>
    %115 = arith.cmpf oge, %86, %114 : vector<1x4x4x128xf32>
    %cst_65 = arith.constant 0.000000e+00 : f32
    %116 = vector.broadcast %cst_65 : f32 to vector<1x4x4x128xf32>
    %117 = arith.subf %116, %113 : vector<1x4x4x128xf32>
    %118 = arith.select %115, %113, %117 : vector<1x4x4x128xi1>, vector<1x4x4x128xf32>
    %cst_66 = arith.constant 1.000000e+00 : f32
    %119 = vector.broadcast %cst_66 : f32 to vector<1x4x4x128xf32>
    %120 = arith.addf %119, %118 : vector<1x4x4x128xf32>
    %121 = arith.mulf %84, %120 : vector<1x4x4x128xf32>
    %122 = arith.truncf %121 : vector<1x4x4x128xf32> to vector<1x4x4x128xbf16>
    %c0_67 = arith.constant 0 : index
    %c0_68 = arith.constant 0 : index
    %c0_69 = arith.constant 0 : index
    %c0_70 = arith.constant 0 : index
    %123 = vector.load %arg6[%c0_67, %c0_68, %c0_69, %c0_70] : memref<1x4x4x128xbf16, #tpu.memory_space<vmem>>, vector<1x4x4x128xbf16>
    tpu.vector_store %arg6[%c0_67, %c0_68, %c0_69, %c0_70], %122 {strides = array<i32>} : memref<1x4x4x128xbf16, #tpu.memory_space<vmem>>, vector<1x4x4x128xbf16>,
    %124 = arith.extf %122 : vector<1x4x4x128xbf16> to vector<1x4x4x128xf32>
    %125 = vector.shape_cast %124 : vector<1x4x4x128xf32> to vector<16x128xf32>
    %cst_71 = arith.constant dense<0.000000e+00> : vector<128xf32>
    %126 = vector.multi_reduction <add>, %125, %cst_71 [0] : vector<16x128xf32> to vector<128xf32>
    %127 = vector.shape_cast %126 : vector<128xf32> to vector<1x128xf32>
    %128 = arith.mulf %125, %125 : vector<16x128xf32>
    %cst_72 = arith.constant dense<0.000000e+00> : vector<128xf32>
    %129 = vector.multi_reduction <add>, %128, %cst_72 [0] : vector<16x128xf32> to vector<128xf32>
    %130 = vector.shape_cast %129 : vector<128xf32> to vector<1x128xf32>
    %131 = tpu.concatenate %127, %130 in 0 : vector<1x128xf32>, vector<1x128xf32> -> vector<2x128xf32>
    %132 = vector.shape_cast %131 : vector<2x128xf32> to vector<1x2x128xf32>
    %c0_73 = arith.constant 0 : index
    %c0_74 = arith.constant 0 : index
    %c0_75 = arith.constant 0 : index
    %133 = vector.load %arg7[%c0_73, %c0_74, %c0_75] : memref<1x2x128xf32, #tpu.memory_space<vmem>>, vector<1x2x128xf32>
    tpu.vector_store %arg7[%c0_73, %c0_74, %c0_75], %132 {strides = array<i32>} : memref<1x2x128xf32, #tpu.memory_space<vmem>>, vector<1x2x128xf32>,
    return
  }
  func.func @transform_0(%arg0: i32, %arg1: i32) -> (i32, i32, i32, i32) {
    %c0_i32 = arith.constant 0 : i32
    %c0_i32_0 = arith.constant 0 : i32
    %c0_i32_1 = arith.constant 0 : i32
    return %arg0, %c0_i32, %c0_i32_0, %arg1 : i32, i32, i32, i32
  }
  func.func @transform_1(%arg0: i32, %arg1: i32) -> (i32, i32) {
    %c0_i32 = arith.constant 0 : i32
    %c0_i32_0 = arith.constant 0 : i32
    return %c0_i32, %arg1 : i32, i32
  }
  func.func @transform_2(%arg0: i32, %arg1: i32) -> (i32, i32) {
    %c0_i32 = arith.constant 0 : i32
    %c0_i32_0 = arith.constant 0 : i32
    return %c0_i32, %arg1 : i32, i32
  }
  func.func @transform_3(%arg0: i32, %arg1: i32) -> (i32, i32) {
    %c0_i32 = arith.constant 0 : i32
    %c0_i32_0 = arith.constant 0 : i32
    return %c0_i32, %arg1 : i32, i32
  }
  func.func @transform_4(%arg0: i32, %arg1: i32) -> (i32, i32, i32, i32) {
    %c0_i32 = arith.constant 0 : i32
    %c0_i32_0 = arith.constant 0 : i32
    %c0_i32_1 = arith.constant 0 : i32
    return %arg0, %c0_i32, %c0_i32_0, %arg1 : i32, i32, i32, i32
  }
  func.func @transform_5(%arg0: i32, %arg1: i32) -> (i32, i32, i32) {
    %c0_i32 = arith.constant 0 : i32
    %c0_i32_0 = arith.constant 0 : i32
    return %arg0, %c0_i32, %arg1 : i32, i32, i32
  }
}

module attributes {stable_mosaic.version = 11 : i64} {
  func.func @matmul_gelu_stats_res_kernel(%arg0: i32, %arg1: memref<32x256xbf16, #tpu.memory_space<vmem>>, %arg2: memref<256x128xbf16, #tpu.memory_space<vmem>>, %arg3: memref<1x128xf32, #tpu.memory_space<vmem>>, %arg4: memref<32x128xbf16, #tpu.memory_space<vmem>>, %arg5: memref<1x2x128xf32, #tpu.memory_space<vmem>>) attributes {dimension_semantics = [#tpu.dimension_semantics<parallel>], iteration_bounds = array<i64: 1>, scalar_prefetch = 0 : i64, scratch_operands = 0 : i64, tpu.core_type = #tpu.core_type<tc>, window_params = [{transform_indices = @transform_0, window_bounds = array<i64: 32, 256>}, {pipeline_mode = #tpu.pipeline_mode<synchronous>, transform_indices = @transform_1, window_bounds = array<i64: 256, 128>}, {pipeline_mode = #tpu.pipeline_mode<synchronous>, transform_indices = @transform_2, window_bounds = array<i64: 1, 128>}, {transform_indices = @transform_3, window_bounds = array<i64: 32, 128>}, {transform_indices = @transform_4, window_bounds = array<i64: 1, 2, 128>}]} {
    %c0 = arith.constant 0 : index
    %c0_0 = arith.constant 0 : index
    %0 = vector.load %arg1[%c0, %c0_0] : memref<32x256xbf16, #tpu.memory_space<vmem>>, vector<32x256xbf16>
    %c0_1 = arith.constant 0 : index
    %c0_2 = arith.constant 0 : index
    %1 = vector.load %arg2[%c0_1, %c0_2] : memref<256x128xbf16, #tpu.memory_space<vmem>>, vector<256x128xbf16>
    %cst = arith.constant dense<0.000000e+00> : vector<32x128xf32>
    %2 = tpu.matmul %0, %1, %cst {dimension_numbers = #tpu.dot_dimension_numbers<[1], [0], [0], [1], [0, 0, 1, 1], [], []>} : vector<32x256xbf16>, vector<256x128xbf16>, vector<32x128xf32> -> vector<32x128xf32>
    %c0_3 = arith.constant 0 : index
    %c0_4 = arith.constant 0 : index
    %3 = vector.load %arg3[%c0_3, %c0_4] : memref<1x128xf32, #tpu.memory_space<vmem>>, vector<1x128xf32>
    %4 = vector.broadcast %3 : vector<1x128xf32> to vector<32x128xf32>
    %5 = arith.addf %2, %4 : vector<32x128xf32>
    %cst_5 = arith.constant 5.000000e-01 : f32
    %6 = vector.broadcast %cst_5 : f32 to vector<32x128xf32>
    %7 = arith.mulf %6, %5 : vector<32x128xf32>
    %cst_6 = arith.constant 0.707106769 : f32
    %8 = vector.broadcast %cst_6 : f32 to vector<32x128xf32>
    %9 = arith.mulf %5, %8 : vector<32x128xf32>
    %10 = math.absf %9 : vector<32x128xf32>
    %cst_7 = arith.constant 0.327591091 : f32
    %11 = vector.broadcast %cst_7 : f32 to vector<32x128xf32>
    %12 = arith.mulf %11, %10 : vector<32x128xf32>
    %cst_8 = arith.constant 1.000000e+00 : f32
    %13 = vector.broadcast %cst_8 : f32 to vector<32x128xf32>
    %14 = arith.addf %13, %12 : vector<32x128xf32>
    %15 = tpu.reciprocal %14 {approx = true} : vector<32x128xf32> -> vector<32x128xf32>
    %cst_9 = arith.constant 1.06140542 : f32
    %16 = vector.broadcast %cst_9 : f32 to vector<32x128xf32>
    %17 = arith.mulf %16, %15 : vector<32x128xf32>
    %cst_10 = arith.constant -1.45315206 : f32
    %18 = vector.broadcast %cst_10 : f32 to vector<32x128xf32>
    %19 = arith.addf %17, %18 : vector<32x128xf32>
    %20 = arith.mulf %19, %15 : vector<32x128xf32>
    %cst_11 = arith.constant 1.42141378 : f32
    %21 = vector.broadcast %cst_11 : f32 to vector<32x128xf32>
    %22 = arith.addf %20, %21 : vector<32x128xf32>
    %23 = arith.mulf %22, %15 : vector<32x128xf32>
    %cst_12 = arith.constant -0.284496725 : f32
    %24 = vector.broadcast %cst_12 : f32 to vector<32x128xf32>
    %25 = arith.addf %23, %24 : vector<32x128xf32>
    %26 = arith.mulf %25, %15 : vector<32x128xf32>
    %cst_13 = arith.constant 0.254829586 : f32
    %27 = vector.broadcast %cst_13 : f32 to vector<32x128xf32>
    %28 = arith.addf %26, %27 : vector<32x128xf32>
    %29 = arith.mulf %28, %15 : vector<32x128xf32>
    %cst_14 = arith.constant 0.000000e+00 : f32
    %30 = vector.broadcast %cst_14 : f32 to vector<32x128xf32>
    %31 = arith.subf %30, %10 : vector<32x128xf32>
    %32 = arith.mulf %31, %10 : vector<32x128xf32>
    %33 = math.exp %32 : vector<32x128xf32>
    %34 = arith.mulf %29, %33 : vector<32x128xf32>
    %cst_15 = arith.constant 1.000000e+00 : f32
    %35 = vector.broadcast %cst_15 : f32 to vector<32x128xf32>
    %36 = arith.subf %35, %34 : vector<32x128xf32>
    %cst_16 = arith.constant 0.000000e+00 : f32
    %37 = vector.broadcast %cst_16 : f32 to vector<32x128xf32>
    %38 = arith.cmpf oge, %9, %37 : vector<32x128xf32>
    %cst_17 = arith.constant 0.000000e+00 : f32
    %39 = vector.broadcast %cst_17 : f32 to vector<32x128xf32>
    %40 = arith.subf %39, %36 : vector<32x128xf32>
    %41 = arith.select %38, %36, %40 : vector<32x128xi1>, vector<32x128xf32>
    %cst_18 = arith.constant 1.000000e+00 : f32
    %42 = vector.broadcast %cst_18 : f32 to vector<32x128xf32>
    %43 = arith.addf %42, %41 : vector<32x128xf32>
    %44 = arith.mulf %7, %43 : vector<32x128xf32>
    %45 = arith.truncf %44 : vector<32x128xf32> to vector<32x128xbf16>
    %c0_19 = arith.constant 0 : index
    %c0_20 = arith.constant 0 : index
    %46 = vector.load %arg4[%c0_19, %c0_20] : memref<32x128xbf16, #tpu.memory_space<vmem>>, vector<32x128xbf16>
    tpu.vector_store %arg4[%c0_19, %c0_20], %45 {strides = array<i32>} : memref<32x128xbf16, #tpu.memory_space<vmem>>, vector<32x128xbf16>,
    %47 = arith.extf %45 : vector<32x128xbf16> to vector<32x128xf32>
    %cst_21 = arith.constant dense<0.000000e+00> : vector<128xf32>
    %48 = vector.multi_reduction <add>, %47, %cst_21 [0] : vector<32x128xf32> to vector<128xf32>
    %49 = vector.shape_cast %48 : vector<128xf32> to vector<1x128xf32>
    %50 = arith.mulf %47, %47 : vector<32x128xf32>
    %cst_22 = arith.constant dense<0.000000e+00> : vector<128xf32>
    %51 = vector.multi_reduction <add>, %50, %cst_22 [0] : vector<32x128xf32> to vector<128xf32>
    %52 = vector.shape_cast %51 : vector<128xf32> to vector<1x128xf32>
    %53 = tpu.concatenate %49, %52 in 0 : vector<1x128xf32>, vector<1x128xf32> -> vector<2x128xf32>
    %54 = vector.shape_cast %53 : vector<2x128xf32> to vector<1x2x128xf32>
    %c0_23 = arith.constant 0 : index
    %c0_24 = arith.constant 0 : index
    %c0_25 = arith.constant 0 : index
    %55 = vector.load %arg5[%c0_23, %c0_24, %c0_25] : memref<1x2x128xf32, #tpu.memory_space<vmem>>, vector<1x2x128xf32>
    tpu.vector_store %arg5[%c0_23, %c0_24, %c0_25], %54 {strides = array<i32>} : memref<1x2x128xf32, #tpu.memory_space<vmem>>, vector<1x2x128xf32>,
    return
  }
  func.func @transform_0(%arg0: i32) -> (i32, i32) {
    %c0_i32 = arith.constant 0 : i32
    %c0_i32_0 = arith.constant 0 : i32
    return %arg0, %c0_i32 : i32, i32
  }
  func.func @transform_1(%arg0: i32) -> (i32, i32) {
    %c0_i32 = arith.constant 0 : i32
    %c0_i32_0 = arith.constant 0 : i32
    %c0_i32_1 = arith.constant 0 : i32
    return %c0_i32, %c0_i32_0 : i32, i32
  }
  func.func @transform_2(%arg0: i32) -> (i32, i32) {
    %c0_i32 = arith.constant 0 : i32
    %c0_i32_0 = arith.constant 0 : i32
    %c0_i32_1 = arith.constant 0 : i32
    return %c0_i32, %c0_i32_0 : i32, i32
  }
  func.func @transform_3(%arg0: i32) -> (i32, i32) {
    %c0_i32 = arith.constant 0 : i32
    %c0_i32_0 = arith.constant 0 : i32
    return %arg0, %c0_i32 : i32, i32
  }
  func.func @transform_4(%arg0: i32) -> (i32, i32, i32) {
    %c0_i32 = arith.constant 0 : i32
    %c0_i32_0 = arith.constant 0 : i32
    %c0_i32_1 = arith.constant 0 : i32
    return %arg0, %c0_i32, %c0_i32_0 : i32, i32, i32
  }
}

module attributes {stable_mosaic.version = 11 : i64} {
  func.func @block_pw_res_kernel(%arg0: i32, %arg1: memref<32x128xbf16, #tpu.memory_space<vmem>>, %arg2: memref<32x128xbf16, #tpu.memory_space<vmem>>, %arg3: memref<2x128xf32, #tpu.memory_space<vmem>>, %arg4: memref<2x128xf32, #tpu.memory_space<vmem>>, %arg5: memref<128x128xbf16, #tpu.memory_space<vmem>>, %arg6: memref<1x128xf32, #tpu.memory_space<vmem>>, %arg7: memref<32x128xbf16, #tpu.memory_space<vmem>>, %arg8: memref<1x2x128xf32, #tpu.memory_space<vmem>>) attributes {dimension_semantics = [#tpu.dimension_semantics<parallel>], iteration_bounds = array<i64: 1>, scalar_prefetch = 0 : i64, scratch_operands = 0 : i64, tpu.core_type = #tpu.core_type<tc>, window_params = [{transform_indices = @transform_0, window_bounds = array<i64: 32, 128>}, {transform_indices = @transform_1, window_bounds = array<i64: 32, 128>}, {pipeline_mode = #tpu.pipeline_mode<synchronous>, transform_indices = @transform_2, window_bounds = array<i64: 2, 128>}, {pipeline_mode = #tpu.pipeline_mode<synchronous>, transform_indices = @transform_3, window_bounds = array<i64: 2, 128>}, {pipeline_mode = #tpu.pipeline_mode<synchronous>, transform_indices = @transform_4, window_bounds = array<i64: 128, 128>}, {pipeline_mode = #tpu.pipeline_mode<synchronous>, transform_indices = @transform_5, window_bounds = array<i64: 1, 128>}, {transform_indices = @transform_6, window_bounds = array<i64: 32, 128>}, {transform_indices = @transform_7, window_bounds = array<i64: 1, 2, 128>}]} {
    %c0 = arith.constant 0 : index
    %c0_0 = arith.constant 0 : index
    %0 = vector.load %arg1[%c0, %c0_0] : memref<32x128xbf16, #tpu.memory_space<vmem>>, vector<32x128xbf16>
    %1 = arith.extf %0 : vector<32x128xbf16> to vector<32x128xf32>
    %c0_1 = arith.constant 0 : index
    %c0_2 = arith.constant 0 : index
    %2 = vector.load %arg3[%c0_1, %c0_2] : memref<2x128xf32, #tpu.memory_space<vmem>>, vector<1x128xf32>
    %3 = vector.broadcast %2 : vector<1x128xf32> to vector<32x128xf32>
    %4 = arith.mulf %1, %3 : vector<32x128xf32>
    %c1 = arith.constant 1 : index
    %c0_3 = arith.constant 0 : index
    %5 = vector.load %arg3[%c1, %c0_3] : memref<2x128xf32, #tpu.memory_space<vmem>>, vector<1x128xf32>
    %6 = vector.broadcast %5 : vector<1x128xf32> to vector<32x128xf32>
    %7 = arith.addf %4, %6 : vector<32x128xf32>
    %c0_4 = arith.constant 0 : index
    %c0_5 = arith.constant 0 : index
    %8 = vector.load %arg2[%c0_4, %c0_5] : memref<32x128xbf16, #tpu.memory_space<vmem>>, vector<32x128xbf16>
    %9 = arith.extf %8 : vector<32x128xbf16> to vector<32x128xf32>
    %c0_6 = arith.constant 0 : index
    %c0_7 = arith.constant 0 : index
    %10 = vector.load %arg4[%c0_6, %c0_7] : memref<2x128xf32, #tpu.memory_space<vmem>>, vector<1x128xf32>
    %11 = vector.broadcast %10 : vector<1x128xf32> to vector<32x128xf32>
    %12 = arith.mulf %9, %11 : vector<32x128xf32>
    %c1_8 = arith.constant 1 : index
    %c0_9 = arith.constant 0 : index
    %13 = vector.load %arg4[%c1_8, %c0_9] : memref<2x128xf32, #tpu.memory_space<vmem>>, vector<1x128xf32>
    %14 = vector.broadcast %13 : vector<1x128xf32> to vector<32x128xf32>
    %15 = arith.addf %12, %14 : vector<32x128xf32>
    %16 = arith.addf %7, %15 : vector<32x128xf32>
    %17 = arith.truncf %16 : vector<32x128xf32> to vector<32x128xbf16>
    %c0_10 = arith.constant 0 : index
    %c0_11 = arith.constant 0 : index
    %18 = vector.load %arg5[%c0_10, %c0_11] : memref<128x128xbf16, #tpu.memory_space<vmem>>, vector<128x128xbf16>
    %cst = arith.constant dense<0.000000e+00> : vector<32x128xf32>
    %19 = tpu.matmul %17, %18, %cst {dimension_numbers = #tpu.dot_dimension_numbers<[1], [0], [0], [1], [0, 0, 1, 1], [], []>} : vector<32x128xbf16>, vector<128x128xbf16>, vector<32x128xf32> -> vector<32x128xf32>
    %c0_12 = arith.constant 0 : index
    %c0_13 = arith.constant 0 : index
    %20 = vector.load %arg6[%c0_12, %c0_13] : memref<1x128xf32, #tpu.memory_space<vmem>>, vector<1x128xf32>
    %21 = vector.broadcast %20 : vector<1x128xf32> to vector<32x128xf32>
    %22 = arith.addf %19, %21 : vector<32x128xf32>
    %cst_14 = arith.constant 5.000000e-01 : f32
    %23 = vector.broadcast %cst_14 : f32 to vector<32x128xf32>
    %24 = arith.mulf %23, %22 : vector<32x128xf32>
    %cst_15 = arith.constant 0.707106769 : f32
    %25 = vector.broadcast %cst_15 : f32 to vector<32x128xf32>
    %26 = arith.mulf %22, %25 : vector<32x128xf32>
    %27 = math.absf %26 : vector<32x128xf32>
    %cst_16 = arith.constant 0.327591091 : f32
    %28 = vector.broadcast %cst_16 : f32 to vector<32x128xf32>
    %29 = arith.mulf %28, %27 : vector<32x128xf32>
    %cst_17 = arith.constant 1.000000e+00 : f32
    %30 = vector.broadcast %cst_17 : f32 to vector<32x128xf32>
    %31 = arith.addf %30, %29 : vector<32x128xf32>
    %32 = tpu.reciprocal %31 {approx = true} : vector<32x128xf32> -> vector<32x128xf32>
    %cst_18 = arith.constant 1.06140542 : f32
    %33 = vector.broadcast %cst_18 : f32 to vector<32x128xf32>
    %34 = arith.mulf %33, %32 : vector<32x128xf32>
    %cst_19 = arith.constant -1.45315206 : f32
    %35 = vector.broadcast %cst_19 : f32 to vector<32x128xf32>
    %36 = arith.addf %34, %35 : vector<32x128xf32>
    %37 = arith.mulf %36, %32 : vector<32x128xf32>
    %cst_20 = arith.constant 1.42141378 : f32
    %38 = vector.broadcast %cst_20 : f32 to vector<32x128xf32>
    %39 = arith.addf %37, %38 : vector<32x128xf32>
    %40 = arith.mulf %39, %32 : vector<32x128xf32>
    %cst_21 = arith.constant -0.284496725 : f32
    %41 = vector.broadcast %cst_21 : f32 to vector<32x128xf32>
    %42 = arith.addf %40, %41 : vector<32x128xf32>
    %43 = arith.mulf %42, %32 : vector<32x128xf32>
    %cst_22 = arith.constant 0.254829586 : f32
    %44 = vector.broadcast %cst_22 : f32 to vector<32x128xf32>
    %45 = arith.addf %43, %44 : vector<32x128xf32>
    %46 = arith.mulf %45, %32 : vector<32x128xf32>
    %cst_23 = arith.constant 0.000000e+00 : f32
    %47 = vector.broadcast %cst_23 : f32 to vector<32x128xf32>
    %48 = arith.subf %47, %27 : vector<32x128xf32>
    %49 = arith.mulf %48, %27 : vector<32x128xf32>
    %50 = math.exp %49 : vector<32x128xf32>
    %51 = arith.mulf %46, %50 : vector<32x128xf32>
    %cst_24 = arith.constant 1.000000e+00 : f32
    %52 = vector.broadcast %cst_24 : f32 to vector<32x128xf32>
    %53 = arith.subf %52, %51 : vector<32x128xf32>
    %cst_25 = arith.constant 0.000000e+00 : f32
    %54 = vector.broadcast %cst_25 : f32 to vector<32x128xf32>
    %55 = arith.cmpf oge, %26, %54 : vector<32x128xf32>
    %cst_26 = arith.constant 0.000000e+00 : f32
    %56 = vector.broadcast %cst_26 : f32 to vector<32x128xf32>
    %57 = arith.subf %56, %53 : vector<32x128xf32>
    %58 = arith.select %55, %53, %57 : vector<32x128xi1>, vector<32x128xf32>
    %cst_27 = arith.constant 1.000000e+00 : f32
    %59 = vector.broadcast %cst_27 : f32 to vector<32x128xf32>
    %60 = arith.addf %59, %58 : vector<32x128xf32>
    %61 = arith.mulf %24, %60 : vector<32x128xf32>
    %62 = arith.truncf %61 : vector<32x128xf32> to vector<32x128xbf16>
    %c0_28 = arith.constant 0 : index
    %c0_29 = arith.constant 0 : index
    %63 = vector.load %arg7[%c0_28, %c0_29] : memref<32x128xbf16, #tpu.memory_space<vmem>>, vector<32x128xbf16>
    tpu.vector_store %arg7[%c0_28, %c0_29], %62 {strides = array<i32>} : memref<32x128xbf16, #tpu.memory_space<vmem>>, vector<32x128xbf16>,
    %64 = arith.extf %62 : vector<32x128xbf16> to vector<32x128xf32>
    %cst_30 = arith.constant dense<0.000000e+00> : vector<128xf32>
    %65 = vector.multi_reduction <add>, %64, %cst_30 [0] : vector<32x128xf32> to vector<128xf32>
    %66 = vector.shape_cast %65 : vector<128xf32> to vector<1x128xf32>
    %67 = arith.mulf %64, %64 : vector<32x128xf32>
    %cst_31 = arith.constant dense<0.000000e+00> : vector<128xf32>
    %68 = vector.multi_reduction <add>, %67, %cst_31 [0] : vector<32x128xf32> to vector<128xf32>
    %69 = vector.shape_cast %68 : vector<128xf32> to vector<1x128xf32>
    %70 = tpu.concatenate %66, %69 in 0 : vector<1x128xf32>, vector<1x128xf32> -> vector<2x128xf32>
    %71 = vector.shape_cast %70 : vector<2x128xf32> to vector<1x2x128xf32>
    %c0_32 = arith.constant 0 : index
    %c0_33 = arith.constant 0 : index
    %c0_34 = arith.constant 0 : index
    %72 = vector.load %arg8[%c0_32, %c0_33, %c0_34] : memref<1x2x128xf32, #tpu.memory_space<vmem>>, vector<1x2x128xf32>
    tpu.vector_store %arg8[%c0_32, %c0_33, %c0_34], %71 {strides = array<i32>} : memref<1x2x128xf32, #tpu.memory_space<vmem>>, vector<1x2x128xf32>,
    return
  }
  func.func @transform_0(%arg0: i32) -> (i32, i32) {
    %c0_i32 = arith.constant 0 : i32
    %c0_i32_0 = arith.constant 0 : i32
    return %arg0, %c0_i32 : i32, i32
  }
  func.func @transform_1(%arg0: i32) -> (i32, i32) {
    %c0_i32 = arith.constant 0 : i32
    %c0_i32_0 = arith.constant 0 : i32
    return %arg0, %c0_i32 : i32, i32
  }
  func.func @transform_2(%arg0: i32) -> (i32, i32) {
    %c0_i32 = arith.constant 0 : i32
    %c0_i32_0 = arith.constant 0 : i32
    %c0_i32_1 = arith.constant 0 : i32
    return %c0_i32, %c0_i32_0 : i32, i32
  }
  func.func @transform_3(%arg0: i32) -> (i32, i32) {
    %c0_i32 = arith.constant 0 : i32
    %c0_i32_0 = arith.constant 0 : i32
    %c0_i32_1 = arith.constant 0 : i32
    return %c0_i32, %c0_i32_0 : i32, i32
  }
  func.func @transform_4(%arg0: i32) -> (i32, i32) {
    %c0_i32 = arith.constant 0 : i32
    %c0_i32_0 = arith.constant 0 : i32
    %c0_i32_1 = arith.constant 0 : i32
    return %c0_i32, %c0_i32_0 : i32, i32
  }
  func.func @transform_5(%arg0: i32) -> (i32, i32) {
    %c0_i32 = arith.constant 0 : i32
    %c0_i32_0 = arith.constant 0 : i32
    %c0_i32_1 = arith.constant 0 : i32
    return %c0_i32, %c0_i32_0 : i32, i32
  }
  func.func @transform_6(%arg0: i32) -> (i32, i32) {
    %c0_i32 = arith.constant 0 : i32
    %c0_i32_0 = arith.constant 0 : i32
    return %arg0, %c0_i32 : i32, i32
  }
  func.func @transform_7(%arg0: i32) -> (i32, i32, i32) {
    %c0_i32 = arith.constant 0 : i32
    %c0_i32_0 = arith.constant 0 : i32
    %c0_i32_1 = arith.constant 0 : i32
    return %arg0, %c0_i32, %c0_i32_0 : i32, i32, i32
  }
}

module attributes {stable_mosaic.version = 11 : i64} {
  func.func @head_kernel(%arg0: i32, %arg1: i32, %arg2: memref<2x16x128xbf16, #tpu.memory_space<vmem>>, %arg3: memref<2x128xf32, #tpu.memory_space<vmem>>, %arg4: memref<128x128xbf16, #tpu.memory_space<vmem>>, %arg5: memref<1x128xf32, #tpu.memory_space<vmem>>, %arg6: memref<2x128xf32, #tpu.memory_space<vmem>>, %arg7: memref<2x128xf32, #tpu.memory_space<vmem>>) attributes {dimension_semantics = [#tpu.dimension_semantics<parallel>, #tpu.dimension_semantics<arbitrary>], iteration_bounds = array<i64: 1, 1>, scalar_prefetch = 0 : i64, scratch_operands = 1 : i64, tpu.core_type = #tpu.core_type<tc>, window_params = [{transform_indices = @transform_0, window_bounds = array<i64: 2, 16, 128>}, {pipeline_mode = #tpu.pipeline_mode<synchronous>, transform_indices = @transform_1, window_bounds = array<i64: 2, 128>}, {pipeline_mode = #tpu.pipeline_mode<synchronous>, transform_indices = @transform_2, window_bounds = array<i64: 128, 128>}, {pipeline_mode = #tpu.pipeline_mode<synchronous>, transform_indices = @transform_3, window_bounds = array<i64: 1, 128>}, {transform_indices = @transform_4, window_bounds = array<i64: 2, 128>}]} {
    %c0_i32 = arith.constant 0 : i32
    %0 = arith.cmpi eq, %arg1, %c0_i32 : i32
    %1 = arith.extui %0 : i1 to i32
    %c0_i32_0 = arith.constant 0 : i32
    %2 = arith.cmpi ne, %1, %c0_i32_0 : i32
    scf.if %2 {
      %cst_12 = arith.constant 0.000000e+00 : f32
      %20 = vector.broadcast %cst_12 : f32 to vector<2x128xf32>
      %c0_13 = arith.constant 0 : index
      %c0_14 = arith.constant 0 : index
      %21 = vector.load %arg7[%c0_13, %c0_14] : memref<2x128xf32, #tpu.memory_space<vmem>>, vector<2x128xf32>
      tpu.vector_store %arg7[%c0_13, %c0_14], %20 {strides = array<i32>} : memref<2x128xf32, #tpu.memory_space<vmem>>, vector<2x128xf32>,
    } else {
    }
    %c0 = arith.constant 0 : index
    %c0_1 = arith.constant 0 : index
    %c0_2 = arith.constant 0 : index
    %3 = vector.load %arg2[%c0, %c0_1, %c0_2] : memref<2x16x128xbf16, #tpu.memory_space<vmem>>, vector<2x16x128xbf16>
    %4 = arith.extf %3 : vector<2x16x128xbf16> to vector<2x16x128xf32>
    %c0_3 = arith.constant 0 : index
    %c0_4 = arith.constant 0 : index
    %5 = vector.load %arg3[%c0_3, %c0_4] : memref<2x128xf32, #tpu.memory_space<vmem>>, vector<1x128xf32>
    %6 = vector.shape_cast %5 : vector<1x128xf32> to vector<1x1x128xf32>
    %7 = vector.broadcast %6 : vector<1x1x128xf32> to vector<2x16x128xf32>
    %8 = arith.mulf %4, %7 : vector<2x16x128xf32>
    %c1 = arith.constant 1 : index
    %c0_5 = arith.constant 0 : index
    %9 = vector.load %arg3[%c1, %c0_5] : memref<2x128xf32, #tpu.memory_space<vmem>>, vector<1x128xf32>
    %10 = vector.shape_cast %9 : vector<1x128xf32> to vector<1x1x128xf32>
    %11 = vector.broadcast %10 : vector<1x1x128xf32> to vector<2x16x128xf32>
    %12 = arith.addf %8, %11 : vector<2x16x128xf32>
    %c0_6 = arith.constant 0 : index
    %c0_7 = arith.constant 0 : index
    %13 = vector.load %arg7[%c0_6, %c0_7] : memref<2x128xf32, #tpu.memory_space<vmem>>, vector<2x128xf32>
    %cst = arith.constant dense<0.000000e+00> : vector<2x128xf32>
    %14 = vector.multi_reduction <add>, %12, %cst [1] : vector<2x16x128xf32> to vector<2x128xf32>
    %15 = arith.addf %13, %14 : vector<2x128xf32>
    %c0_8 = arith.constant 0 : index
    %c0_9 = arith.constant 0 : index
    %16 = vector.load %arg7[%c0_8, %c0_9] : memref<2x128xf32, #tpu.memory_space<vmem>>, vector<2x128xf32>
    tpu.vector_store %arg7[%c0_8, %c0_9], %15 {strides = array<i32>} : memref<2x128xf32, #tpu.memory_space<vmem>>, vector<2x128xf32>,
    %c0_i32_10 = arith.constant 0 : i32
    %17 = arith.cmpi eq, %arg1, %c0_i32_10 : i32
    %18 = arith.extui %17 : i1 to i32
    %c0_i32_11 = arith.constant 0 : i32
    %19 = arith.cmpi ne, %18, %c0_i32_11 : i32
    scf.if %19 {
      %c0_12 = arith.constant 0 : index
      %c0_13 = arith.constant 0 : index
      %20 = vector.load %arg7[%c0_12, %c0_13] : memref<2x128xf32, #tpu.memory_space<vmem>>, vector<2x128xf32>
      %cst_14 = arith.constant 6.250000e-02 : f32
      %21 = vector.broadcast %cst_14 : f32 to vector<2x128xf32>
      %22 = arith.mulf %20, %21 : vector<2x128xf32>
      %23 = arith.truncf %22 : vector<2x128xf32> to vector<2x128xbf16>
      %c0_15 = arith.constant 0 : index
      %c0_16 = arith.constant 0 : index
      %24 = vector.load %arg4[%c0_15, %c0_16] : memref<128x128xbf16, #tpu.memory_space<vmem>>, vector<128x128xbf16>
      %cst_17 = arith.constant dense<0.000000e+00> : vector<2x128xf32>
      %25 = tpu.matmul %23, %24, %cst_17 {dimension_numbers = #tpu.dot_dimension_numbers<[1], [0], [0], [1], [0, 0, 1, 1], [], []>} : vector<2x128xbf16>, vector<128x128xbf16>, vector<2x128xf32> -> vector<2x128xf32>
      %c0_18 = arith.constant 0 : index
      %c0_19 = arith.constant 0 : index
      %26 = vector.load %arg5[%c0_18, %c0_19] : memref<1x128xf32, #tpu.memory_space<vmem>>, vector<1x128xf32>
      %27 = vector.broadcast %26 : vector<1x128xf32> to vector<2x128xf32>
      %28 = arith.addf %25, %27 : vector<2x128xf32>
      %c0_20 = arith.constant 0 : index
      %c0_21 = arith.constant 0 : index
      %29 = vector.load %arg6[%c0_20, %c0_21] : memref<2x128xf32, #tpu.memory_space<vmem>>, vector<2x128xf32>
      tpu.vector_store %arg6[%c0_20, %c0_21], %28 {strides = array<i32>} : memref<2x128xf32, #tpu.memory_space<vmem>>, vector<2x128xf32>,
    } else {
    }
    return
  }
  func.func @transform_0(%arg0: i32, %arg1: i32) -> (i32, i32, i32) {
    %c0_i32 = arith.constant 0 : i32
    %c0_i32_0 = arith.constant 0 : i32
    return %arg0, %arg1, %c0_i32 : i32, i32, i32
  }
  func.func @transform_1(%arg0: i32, %arg1: i32) -> (i32, i32) {
    %c0_i32 = arith.constant 0 : i32
    %c0_i32_0 = arith.constant 0 : i32
    %c0_i32_1 = arith.constant 0 : i32
    return %c0_i32, %c0_i32_0 : i32, i32
  }
  func.func @transform_2(%arg0: i32, %arg1: i32) -> (i32, i32) {
    %c0_i32 = arith.constant 0 : i32
    %c0_i32_0 = arith.constant 0 : i32
    %c0_i32_1 = arith.constant 0 : i32
    return %c0_i32, %c0_i32_0 : i32, i32
  }
  func.func @transform_3(%arg0: i32, %arg1: i32) -> (i32, i32) {
    %c0_i32 = arith.constant 0 : i32
    %c0_i32_0 = arith.constant 0 : i32
    %c0_i32_1 = arith.constant 0 : i32
    return %c0_i32, %c0_i32_0 : i32, i32
  }
  func.func @transform_4(%arg0: i32, %arg1: i32) -> (i32, i32) {
    %c0_i32 = arith.constant 0 : i32
    %c0_i32_0 = arith.constant 0 : i32
    return %arg0, %c0_i32 : i32, i32
  }
}

</mosaic_0001>

<bundles_post_ra>
// kernel: convmixer_forward.8
= control target key start
LH: loop header
LB: loop body
LE: loop exit
PB: predicated region body
PF: predicated region fallthrough
CT: control target
= control target key end

     0   :  { %vm354_vm4 = vcmask 1040384   ;;  %s601_s4 = inlined_call_operand.vmem [shape: bf16[128,128], index: 4, kind: input, shape index: {}]   ;;  %s602_s0 = inlined_call_operand.vmem [shape: bf16[32,128], index: 0, kind: input, shape index: {}]   ;;  %s603_s2 = inlined_call_operand.vmem [shape: f32[2,128], index: 2, kind: input, shape index: {}]   ;;  %s604_s1 = inlined_call_operand.vmem [shape: bf16[32,128], index: 1, kind: input, shape index: {}]   ;;  %s605_s3 = inlined_call_operand.vmem [shape: f32[2,128], index: 3, kind: input, shape index: {}]   ;;  %s606_s5 = inlined_call_operand.vmem [shape: f32[1,128], index: 5, kind: input, shape index: {}]   ;;  %s607_s6 = inlined_call_operand.vmem [shape: bf16[32,128], index: 6, kind: output, shape index: {0}]   ;;  %s608_s7 = inlined_call_operand.vmem [shape: f32[1,2,128], index: 7, kind: output, shape index: {1}]  }
   0x1   :  { %v445_v0 = vld [vmem:[%s601_s4] sm:$0xff]   ;;  %v446_v1 = vld [vmem:[%s601_s4 + $0x8] sm:$0xff]   ;;  %v447_v2 = vld [vmem:[%s601_s4 + $0x10] sm:$0xff]  }
   0x2   :  { %425 = vmatprep.subr.bf16.mxu0 %v445_v0  ;;  %v448_v3 = vld [vmem:[%s601_s4 + $0x18] sm:$0xff]   ;;  %v387_v4 = vld [vmem:[%s602_s0] sm:$0xff]   ;;  %v412_v9 = vld [vmem:[%s602_s0 + $0x8] sm:$0xff]  }
   0x3   :  { %426 = vmatpush3.bf16.msra.mxu0 %v445_v0  ;;  %v365_v5 = vld [vmem:[%s603_s2] ss:$0 sm:$0xff]  ;;  %v388_v6 = vunpack.c.l.bf16 %v387_v4  ;;  %v389_v7 = vunpack.c.h.bf16 %v387_v4  ;;  %v366_v10 = vld [vmem:[%s603_s2 + $0x1] ss:$0 sm:$0xff]  ;;  %v413_v16 = vld [vmem:[%s604_s1 + $0x8] sm:$0xff]   ;;  %v392_v23 = vunpack.c.l.bf16 %v412_v9  ;;  %v393_v24 = vunpack.c.h.bf16 %v412_v9 }
   0x4   :  { %427 = vmatprep.subr.bf16.mxu0 %v446_v1  ;;  %v395_v8 = vld [vmem:[%s604_s1] sm:$0xff]   ;;  %v400_v27 = vunpack.c.l.bf16 %v413_v16  ;;  %v401_v28 = vunpack.c.h.bf16 %v413_v16  ;;  %v450_v29 = vld [vmem:[%s601_s4 + $0x28] sm:$0xff]   ;;  %v451_v37 = vld [vmem:[%s601_s4 + $0x30] sm:$0xff]  }
   0x5   :  { %v396_v11 = vunpack.c.l.bf16 %v395_v8  ;;  %v397_v12 = vunpack.c.h.bf16 %v395_v8  ;;  %v367_v13 = vld [vmem:[%s605_s3] ss:$0 sm:$0xff]  ;;  %v39_v14 = vmul.f32 %v388_v6, %v365_v5  ;;  %v40_v15 = vmul.f32 %v389_v7, %v365_v5  ;;  %v368_v17 = vld [vmem:[%s605_s3 + $0x1] ss:$0 sm:$0xff]  ;;  %v452_v42 = vld [vmem:[%s601_s4 + $0x38] sm:$0xff]  }
   0x6   :  { %v449_v18 = vld [vmem:[%s601_s4 + $0x20] sm:$0xff]   ;;  %v41_v32 = vmul.f32 %v392_v23, %v365_v5  ;;  %v42_v34 = vmul.f32 %v393_v24, %v365_v5  ;;  %v67_v35 = vmul.f32 %v400_v27, %v367_v13  ;;  %v68_v36 = vmul.f32 %v401_v28, %v367_v13 }
   0x7   :  { %428 = vmatpush3.bf16.msra.mxu0 %v446_v1  ;;  %v65_v19 = vmul.f32 %v396_v11, %v367_v13  ;;  %v66_v20 = vmul.f32 %v397_v12, %v367_v13  ;;  %v48_v21 = vadd.f32 %v366_v10, %v39_v14  ;;  %v49_v22 = vadd.f32 %v366_v10, %v40_v15  ;;  %v369_v46 = vld [vmem:[%s606_s5] ss:$0 sm:$0xff] }
   0x8   :  { %429 = vmatprep.subr.bf16.mxu0 %v447_v2  ;;  %v50_v38 = vadd.f32 %v366_v10, %v41_v32  ;;  %v51_v39 = vadd.f32 %v366_v10, %v42_v34  ;;  %v76_v40 = vadd.f32 %v368_v17, %v67_v35  ;;  %v77_v41 = vadd.f32 %v368_v17, %v68_v36 }
   0x9   :  { %v74_v25 = vadd.f32 %v368_v17, %v65_v19  ;;  %v75_v26 = vadd.f32 %v368_v17, %v66_v20 }
   0xa   :  { %v80_v43 = vadd.f32 %v76_v40, %v50_v38  ;;  %v81_v44 = vadd.f32 %v77_v41, %v51_v39 }
   0xb   :  { %430 = vmatpush3.bf16.msra.mxu0 %v447_v2  ;;  %v78_v30 = vadd.f32 %v74_v25, %v48_v21  ;;  %v79_v31 = vadd.f32 %v75_v26, %v49_v22 }
   0xc   :  { %431 = vmatprep.subr.bf16.mxu0 %v448_v3  ;;  %v83_v45 = vpack.c.bf16 %v81_v44, %v80_v43 }
   0xd   :  { %v82_v33 = vpack.c.bf16 %v79_v31, %v78_v30 }
   0xf   :  { %432 = vmatpush3.bf16.msra.mxu0 %v448_v3  ;;  %441 = vmatprep.mubr.bf16.mxu0 %v82_v33 }
  0x10   :  { %433 = vmatprep.subr.bf16.mxu0 %v449_v18 }
  0x13   :  { %434 = vmatpush3.bf16.msra.mxu0 %v449_v18 }
  0x14   :  { %435 = vmatprep.subr.bf16.mxu0 %v450_v29 }
  0x17   :  { %436 = vmatpush3.bf16.msra.mxu0 %v450_v29 }
  0x18   :  { %437 = vmatprep.subr.bf16.mxu0 %v451_v37 }
  0x1b   :  { %438 = vmatpush3.bf16.msra.mxu0 %v451_v37 }
  0x1c   :  { %439 = vmatprep.subr.bf16.mxu0 %v452_v42 }
  0x1f   :  { %440 = vmatpush3.bf16.msra.mxu0 %v452_v42 }
  0x22   :  { %442 = vmatmul.mubr.bf16.vlgmr.msra.gmra.mrb[0].mxu0 %v83_v45 }
  0xf5   :  { %v443_v47 = vpop.f32.mrb[0].mxu0 }
  0xf6   :  { %v560_v48 = vadd.f32 %v443_v47, %v369_v46  ;;  %v189_v49 = vpop.f32.mrb[1].mxu0 }
  0xf7   :  { %v562_v50 = vadd.f32 %v369_v46, %v189_v49  ;;  %v444_v51 = vpop.f32.mrb[2].mxu0 }
  0xf8   :  { %v565_v52 = vmul.f32 0.70710677, %v560_v48  ;;  %v567_v53 = vadd.f32 %v444_v51, %v369_v46  ;;  %v192_v54 = vpop.f32.mrb[3].mxu0 }
  0xf9   :  { %v570_v55 = vmul.f32 0.70710677, %v562_v50  ;;  %v572_v56 = vadd.f32 %v369_v46, %v192_v54 }
  0xfa   :  { %v214_v57 = vand.u32 2147483647, %v565_v52  ;;  %v576_v58 = vmul.f32 0.70710677, %v567_v53  ;;  %vm290_vm0 = vcmp.ge.f32.partialorder %v565_v52, 0.0 }
  0xfb   :  { %v212_v59 = vand.u32 2147483647, %v570_v55  ;;  %v580_v60 = vmul.f32 0.70710677, %v572_v56  ;;  %vm288_vm1 = vcmp.ge.f32.partialorder %v570_v55, 0.0 }
  0xfc   :  { %v218_v61 = vmul.f32 0.3275911, %v214_v57  ;;  %v215_v62 = vand.u32 2147483647, %v576_v58  ;;  %v266_v7 = vsub.f32 0.0, %v214_v57  ;;  %vm291_vm2 = vcmp.ge.f32.partialorder %v576_v58, 0.0 }
  0xfd   :  { %v216_v63 = vmul.f32 0.3275911, %v212_v59  ;;  %v213_v0 = vand.u32 2147483647, %v580_v60  ;;  %v264_v8 = vsub.f32 0.0, %v212_v59  ;;  %vm289_vm3 = vcmp.ge.f32.partialorder %v580_v60, 0.0 }
  0xfe   :  { %v222_v1 = vadd.f32 1.0, %v218_v61  ;;  %v219_v2 = vmul.f32 0.3275911, %v215_v62  ;;  %v270_v10 = vmul.f32 %v266_v7, %v214_v57  ;;  %v267_v11 = vsub.f32 0.0, %v215_v62 }
  0xff   :  { %v220_v3 = vadd.f32 1.0, %v216_v63  ;;  %v217_v4 = vmul.f32 0.3275911, %v213_v0  ;;  %v268_v14 = vmul.f32 %v264_v8, %v212_v59  ;;  %v265_v16 = vsub.f32 0.0, %v213_v0 }
 0x100   :  { %453 = vrcp.f32 %v222_v1  ;;  %v223_v5 = vadd.f32 1.0, %v219_v2  ;;  %v276_v19 = vmul.f32 1.442695, %v270_v10  ;;  %v271_v21 = vmul.f32 %v267_v11, %v215_v62 }
 0x101   :  { %455 = vrcp.f32 %v220_v3  ;;  %v221_v6 = vadd.f32 1.0, %v217_v4  ;;  %v272_v23 = vmul.f32 1.442695, %v268_v14  ;;  %v269_v27 = vmul.f32 %v265_v16, %v213_v0 }
 0x102   :  { %457 = vrcp.f32 %v223_v5  ;;  %v278_v32 = vmul.f32 1.442695, %v271_v21 }
 0x103   :  { %459 = vrcp.f32 %v221_v6  ;;  %v274_v37 = vmul.f32 1.442695, %v269_v27 }
 0x104   :  { %461 = vpow2.f32 %v276_v19 }
 0x105   :  { %463 = vpow2.f32 %v272_v23 }
 0x106   :  { %465 = vpow2.f32 %v278_v32 }
 0x107   :  { %467 = vpow2.f32 %v274_v37 }
 0x10a   :  { %v454_v9 = vpop.eup %453 }
 0x10b   :  { %v456_v12 = vpop.eup %455  ;;  %v230_v13 = vmul.f32 1.0614054, %v454_v9 }
 0x10c   :  { %v228_v15 = vmul.f32 1.0614054, %v456_v12  ;;  %v458_v18 = vpop.eup %457 }
 0x10d   :  { %v234_v17 = vadd.f32 -1.4531521, %v230_v13  ;;  %v231_v24 = vmul.f32 1.0614054, %v458_v18  ;;  %v460_v25 = vpop.eup %459 }
 0x10e   :  { %v232_v20 = vadd.f32 -1.4531521, %v228_v15  ;;  %v229_v30 = vmul.f32 1.0614054, %v460_v25  ;;  %v462_v61 = vpop.eup %461 }
 0x10f   :  { %v238_v22 = vmul.f32 %v454_v9, %v234_v17  ;;  %v235_v29 = vadd.f32 -1.4531521, %v231_v24  ;;  %v464_v63 = vpop.eup %463 }
 0x110   :  { %v236_v26 = vmul.f32 %v456_v12, %v232_v20  ;;  %v233_v35 = vadd.f32 -1.4531521, %v229_v30  ;;  %v466_v7 = vpop.eup %465 }
 0x111   :  { %v242_v28 = vadd.f32 1.4214138, %v238_v22  ;;  %v239_v34 = vmul.f32 %v458_v18, %v235_v29  ;;  %v468_v14 = vpop.eup %467  ;;  %v205_v29 = vmul.f32 0.5, %v572_v56 }
 0x112   :  { %v240_v31 = vadd.f32 1.4214138, %v236_v26  ;;  %v237_v40 = vmul.f32 %v460_v25, %v233_v35  ;;  %v204_v26 = vmul.f32 0.5, %v562_v50 }
 0x113   :  { %v246_v33 = vmul.f32 %v454_v9, %v242_v28  ;;  %v243_v39 = vadd.f32 1.4214138, %v239_v34 }
 0x114   :  { %v244_v36 = vmul.f32 %v456_v12, %v240_v31  ;;  %v241_v44 = vadd.f32 1.4214138, %v237_v40 }
 0x115   :  { %v250_v38 = vadd.f32 -0.28449672, %v246_v33  ;;  %v247_v43 = vmul.f32 %v458_v18, %v243_v39 }
 0x116   :  { %v248_v41 = vadd.f32 -0.28449672, %v244_v36  ;;  %v245_v49 = vmul.f32 %v460_v25, %v241_v44 }
 0x117   :  { %v254_v42 = vmul.f32 %v454_v9, %v250_v38  ;;  %v251_v47 = vadd.f32 -0.28449672, %v247_v43 }
 0x118   :  { %v252_v45 = vmul.f32 %v456_v12, %v248_v41  ;;  %v249_v59 = vadd.f32 -0.28449672, %v245_v49 }
 0x119   :  { %v258_v46 = vadd.f32 0.2548296, %v254_v42  ;;  %v255_v57 = vmul.f32 %v458_v18, %v251_v47 }
 0x11a   :  { %v256_v51 = vadd.f32 0.2548296, %v252_v45  ;;  %v253_v2 = vmul.f32 %v460_v25, %v249_v59 }
 0x11b   :  { %v262_v54 = vmul.f32 %v454_v9, %v258_v46  ;;  %v259_v1 = vadd.f32 0.2548296, %v255_v57 }
 0x11c   :  { %v260_v62 = vmul.f32 %v456_v12, %v256_v51  ;;  %v257_v6 = vadd.f32 0.2548296, %v253_v2 }
 0x11d   :  { %v282_v0 = vmul.f32 %v462_v61, %v262_v54  ;;  %v263_v5 = vmul.f32 %v458_v18, %v259_v1  ;;  %v206_v18 = vmul.f32 0.5, %v560_v48 }
 0x11e   :  { %v280_v3 = vmul.f32 %v464_v63, %v260_v62  ;;  %v261_v13 = vmul.f32 %v460_v25, %v257_v6  ;;  %v207_v25 = vmul.f32 0.5, %v567_v53 }
 0x11f   :  { %v286_v4 = vsub.f32 1.0, %v282_v0  ;;  %v283_v11 = vmul.f32 %v466_v7, %v263_v5 }
 0x120   :  { %v284_v8 = vsub.f32 1.0, %v280_v3  ;;  %v281_v12 = vmul.f32 %v468_v14, %v261_v13 }
 0x121   :  { %v294_v10 = vsub.f32 0.0, %v286_v4  ;;  %v287_v16 = vsub.f32 1.0, %v283_v11 }
 0x122   :  { %v292_v9 = vsub.f32 0.0, %v284_v8  ;;  %v285_v20 = vsub.f32 1.0, %v281_v12 }
 0x123   :  { %v298_v15 = vsel %vm290_vm0, %v286_v4, %v294_v10  ;;  %v295_v19 = vsub.f32 0.0, %v287_v16 }
 0x124   :  { %v296_v17 = vsel %vm288_vm1, %v284_v8, %v292_v9  ;;  %v302_v21 = vadd.f32 1.0, %v298_v15  ;;  %v293_v23 = vsub.f32 0.0, %v285_v20 }
 0x125   :  { %v299_v22 = vsel %vm291_vm2, %v287_v16, %v295_v19  ;;  %v300_v24 = vadd.f32 1.0, %v296_v17 }
 0x126   :  { %v303_v52 = vadd.f32 1.0, %v299_v22  ;;  %v297_v27 = vsel %vm289_vm3, %v285_v20, %v293_v23  ;;  %v306_v55 = vmul.f32 %v302_v21, %v206_v18 }
 0x127   :  { %v301_v30 = vadd.f32 1.0, %v297_v27  ;;  %v304_v31 = vmul.f32 %v300_v24, %v204_v26 }
 0x128   :  { %v307_v28 = vmul.f32 %v303_v52, %v207_v25 }
 0x129   :  { %v305_v32 = vmul.f32 %v301_v30, %v205_v29 }
 0x12a   :  { %v309_v58 = vpack.c.bf16 %v307_v28, %v306_v55 }
 0x12b   :  { %v308_v48 = vpack.c.bf16 %v305_v32, %v304_v31 }
 0x12c   :  { %414 = vst [vmem:[%s607_s6 + $0x8] sm:$0xff] %v309_v58   ;;  %v330_v53 = vunpack.c.l.bf16 %v309_v58  ;;  %v331_v33 = vunpack.c.h.bf16 %v309_v58 }
 0x12d   :  { %406 = vst [vmem:[%s607_s6] sm:$0xff] %v308_v48   ;;  %v328_v50 = vunpack.c.l.bf16 %v308_v48  ;;  %v329_v60 = vunpack.c.h.bf16 %v308_v48 }
 0x12e   :  { %v343_v36 = vmul.f32 %v330_v53, %v330_v53  ;;  %v344_v39 = vmul.f32 %v331_v33, %v331_v33 }
 0x12f   :  { %v332_v34 = vadd.f32 %v329_v60, %v328_v50  ;;  %v341_v35 = vmul.f32 %v328_v50, %v328_v50  ;;  %v342_v56 = vmul.f32 %v329_v60, %v329_v60 }
 0x131   :  { %v333_v37 = vadd.f32 %v332_v34, %v330_v53  ;;  %v345_v38 = vadd.f32 %v342_v56, %v341_v35 }
 0x133   :  { %v334_v40 = vadd.f32 %v333_v37, %v331_v33  ;;  %v346_v41 = vadd.f32 %v345_v38, %v343_v36 }
 0x135   :  { %v335_v42 = vrot.slane %v334_v40, 4  ;;  %v347_v43 = vadd.f32 %v346_v41, %v344_v39 }
 0x137   :  { %v336_v44 = vadd.f32 %v335_v42, %v334_v40  ;;  %v348_v45 = vrot.slane %v347_v43, 4 }
 0x139   :  { %v337_v46 = vrot.slane %v336_v44, 2  ;;  %v349_v47 = vadd.f32 %v348_v45, %v347_v43 }
 0x13b   :  { %v338_v49 = vadd.f32 %v337_v46, %v336_v44  ;;  %v350_v51 = vrot.slane %v349_v47, 2 }
 0x13d   :  { %v339_v54 = vrot.slane %v338_v49, 1  ;;  %v351_v57 = vadd.f32 %v350_v51, %v349_v47 }
 0x13f   :  { %v352_v59 = vrot.slane %v351_v57, 1  ;;  %v340_v61 = vadd.f32 %v339_v54, %v338_v49 }
 0x141   :  { %v353_v62 = vadd.f32 %v352_v59, %v351_v57 }
 0x143   :  { %v355_v63 = vsel %vm354_vm4, %v340_v61, %v353_v62 }
 0x144   :  { %356 = vst [vmem:[%s608_s7] sm:$0x3] %v355_v63 }

// kernel: convmixer_forward.7
= control target key start
LH: loop header
LB: loop body
LE: loop exit
PB: predicated region body
PF: predicated region fallthrough
CT: control target
= control target key end

     0   :  { %s1148_s18 = smov 0   ;;  %s1150_s19 = smov 0   ;;  %s1390_s0 = inlined_call_operand.vmem [shape: bf16[2,4,4,128], index: 0, kind: input, shape index: {}]   ;;  %s1391_s1 = inlined_call_operand.vmem [shape: f32[2,128], index: 1, kind: input, shape index: {}]   ;;  %s1392_s2 = inlined_call_operand.vmem [shape: f32[9,128], index: 2, kind: input, shape index: {}]   ;;  %s1393_s3 = inlined_call_operand.vmem [shape: f32[1,128], index: 3, kind: input, shape index: {}]   ;;  %s1394_s4 = inlined_call_operand.vmem [shape: bf16[2,4,4,128], index: 4, kind: output, shape index: {0}]   ;;  %s1395_s5 = inlined_call_operand.vmem [shape: f32[2,2,128], index: 5, kind: output, shape index: {1}]  }
   0x1   :  { %s1152_s20 = smov 0  }
   0x2 LB: > { %s28_s21 = sadd.s32 1, %s1111_s19  ;;  %p1022_p0 = scmp.ge.s32.totalorder %s1115_s20, 1  ;;  %s1115_s20 = sphi %s1152_s20, %s16_s20   ;;  %s1111_s19 = sphi %s1150_s19, %s1403_s19   ;;  %s1107_s18 = sphi %s1148_s18, %s1402_s18  }
   0x3   : > { %p30_p1 = scmp.ge.s32.totalorder %s28_s21, 2  ;;  %p237_p2 = scmp.lt.s32.totalorder %s1115_s20, 3 }
   0x5   : > { %s1405_s21 = smov (%p30_p1, %s28_s21), 0  ;;  %p238_p3 = pnand %p1022_p0, %p237_p2 }
   0x6   : > { %vm327_vm0 = vcmask (!%p238_p3), 1040384   ;;  %vm328_vm1 = vsmask.f32 (!%p238_p3), 256  ;;  %v333_v0 = vld [vmem:[#allocation2 + $0x4] sm:$0x1] (!%p238_p3)  ;;  %v1117_v1 = vmov (!%p238_p3), 0  }
   0x7   : > { %241 = sbr.rel (%p238_p3) target bundleno = 149 (0x95), region = 36  ;;  %324 = vst [vmem:[#allocation2] sm:$0x7] (!%p238_p3), %v1117_v1  ;;  %326 = vst [vmem:[#allocation2 + $0x14] sm:$0x7] (!%p238_p3), %v1117_v1  ;;  %vm348_vm3 = vcmask (!%p238_p3), 1042434  }
   0x8   : > { %vm1169_vm2 = vmand (!%p238_p3), %vm327_vm0, %vm328_vm1  ;;  %v336_v3 = vld [vmem:[#allocation2 + $0x8] sm:$0x1] (!%p238_p3)  ;;  %v339_v4 = vld [vmem:[#allocation2 + $0xc] sm:$0x1] (!%p238_p3)  ;;  %p289_p4 = scmp.lt.s32.totalorder (!%p238_p3), %s1107_s18, 1  ;;  %vm444_vm6 = vcmask (!%p238_p3), 1042432  }
   0x9   : > { %v334_v5 = vsel (!%p238_p3), %vm1169_vm2, 0, %v333_v0  ;;  %v337_v6 = vsel (!%p238_p3), %vm1169_vm2, 0, %v336_v3  ;;  %v340_v7 = vsel (!%p238_p3), %vm1169_vm2, 0, %v339_v4  ;;  %v342_v8 = vld [vmem:[#allocation2 + $0x10] sm:$0x1] (!%p238_p3) }
   0xa   : > { %335 = vst [vmem:[#allocation2 + $0x4] sm:$0x1] (!%p238_p3), %v334_v5  ;;  %338 = vst [vmem:[#allocation2 + $0x8] sm:$0x1] (!%p238_p3), %v337_v6  ;;  %v343_v9 = vsel (!%p238_p3), %vm1169_vm2, 0, %v342_v8 }
   0xb   : > { %341 = vst [vmem:[#allocation2 + $0xc] sm:$0x1] (!%p238_p3), %v340_v7  ;;  %vm349_vm4 = vsmask.f32 (!%p238_p3), 7946  ;;  %v354_v10 = vld [vmem:[#allocation2 + $0x4] sm:$0x4] (!%p238_p3) }
   0xc   : > { %344 = vst [vmem:[#allocation2 + $0x10] sm:$0x1] (!%p238_p3), %v343_v9  ;;  %vm1185_vm5 = vmand (!%p238_p3), %vm348_vm3, %vm349_vm4  ;;  %v357_v12 = vld [vmem:[#allocation2 + $0x8] sm:$0x4] (!%p238_p3)  ;;  %v360_v13 = vld [vmem:[#allocation2 + $0xc] sm:$0x4] (!%p238_p3) }
   0xd   : > { %v355_v14 = vsel (!%p238_p3), %vm1185_vm5, 0, %v354_v10  ;;  %v358_v15 = vsel (!%p238_p3), %vm1185_vm5, 0, %v357_v12  ;;  %v361_v16 = vsel (!%p238_p3), %vm1185_vm5, 0, %v360_v13  ;;  %v363_v17 = vld [vmem:[#allocation2 + $0x10] sm:$0x4] (!%p238_p3) }
   0xe   : > { %s1407_s18 = smov (!%p289_p4, %s1107_s18), 1  ;;  %356 = vst [vmem:[#allocation2 + $0x4] sm:$0x4] %v355_v14  ;;  %359 = vst [vmem:[#allocation2 + $0x8] sm:$0x4] %v358_v15  ;;  %v364_v18 = vsel %vm1185_vm5, 0, %v363_v17 }
   0xf   : > { %s1046_s22 = sshll.u32 %s1407_s18, 3  ;;  %362 = vst [vmem:[#allocation2 + $0xc] sm:$0x4] %v361_v16  ;;  %v1028_v19 = vld [vmem:[%s1391_s1] ss:$0 sm:$0xff] }
  0x10   : > { %s296_s25 = scalar_lea.vmem %s1390_s0, %s1046_s22  ;;  %365 = vst [vmem:[#allocation2 + $0x10] sm:$0x4] %v364_v18  ;;  %v1029_v21 = vld [vmem:[%s1391_s1 + $0x1] ss:$0 sm:$0xff]  ;;  %v330_v24 = vld [vmem:[#allocation2] sm:$0x1]  ;;  %s1365_s7 = scalar_lea.vmem %s1394_s4, %s1046_s22 }
  0x11   : > { %v369_v20 = vld [vmem:[%s296_s25] sm:$0x3]  ;;  %v370_v22 = vld [vmem:[%s296_s25 + $0x2] sm:$0x3]  ;;  %v371_v23 = vld [vmem:[%s296_s25 + $0x4] sm:$0x3] }
  0x12   : > { %v351_v25 = vld [vmem:[#allocation2] sm:$0x4]  ;;  %v345_v26 = vld [vmem:[#allocation2 + $0x14] sm:$0x1]  ;;  %v373_v27 = vunpack.c.l.bf16 %v369_v20  ;;  %v374_v28 = vunpack.c.l.bf16 %v370_v22  ;;  %v375_v29 = vunpack.c.l.bf16 %v371_v23  ;;  %v331_v30 = vsel %vm1169_vm2, 0, %v330_v24  ;;  %s1027_s22 = sshll.u32 %s1407_s18, 1 }
  0x13   : > { %v352_v31 = vsel %vm1185_vm5, 0, %v351_v25  ;;  %v346_v32 = vsel %vm1169_vm2, 0, %v345_v26  ;;  %v366_v33 = vld [vmem:[#allocation2 + $0x14] sm:$0x4]  ;;  %332 = vst [vmem:[#allocation2] sm:$0x1] %v331_v30  ;;  %s322_s10 = scalar_lea.vmem %s1395_s5, %s1027_s22 }
  0x14   : > { %353 = vst [vmem:[#allocation2] sm:$0x4] %v352_v31  ;;  %347 = vst [vmem:[#allocation2 + $0x14] sm:$0x1] %v346_v32  ;;  %v367_v34 = vsel %vm1185_vm5, 0, %v366_v33  ;;  %v382_v35 = vmul.f32 %v1028_v19, %v373_v27  ;;  %v383_v36 = vmul.f32 %v1028_v19, %v374_v28  ;;  %v384_v37 = vmul.f32 %v1028_v19, %v375_v29 }
  0x15   : > { %v372_v38 = vld [vmem:[%s296_s25 + $0x6] sm:$0x3]  ;;  %368 = vst [vmem:[#allocation2 + $0x14] sm:$0x4] %v367_v34  ;;  %vm445_vm7 = vsmask.f32 2306 }
  0x16   : > { %v376_v39 = vunpack.c.l.bf16 %v372_v38  ;;  %v391_v40 = vadd.f32 %v1029_v21, %v382_v35  ;;  %v392_v41 = vadd.f32 %v1029_v21, %v383_v36  ;;  %v393_v42 = vadd.f32 %v1029_v21, %v384_v37  ;;  %v447_v56 = vld [vmem:[#allocation2 + $0x4] sm:$0x7]  ;;  %vm1217_vm8 = vmand %vm444_vm6, %vm445_vm7  ;;  %v450_v59 = vld [vmem:[#allocation2 + $0x8] sm:$0x7] }
  0x17   : > { %v453_v1 = vld [vmem:[#allocation2 + $0xc] sm:$0x7]  ;;  %v456_v6 = vld [vmem:[#allocation2 + $0x10] sm:$0x7]  ;;  %v1232_v14 = vld [vmem:[%s1392_s2 + $0x1] ss:$0 sm:$0xff] }
  0x18   : > { %v385_v43 = vmul.f32 %v1028_v19, %v376_v39  ;;  %v1048_v44 = vpack.c.bf16 %v391_v40, %v391_v40  ;;  %v1049_v45 = vpack.c.bf16 %v392_v41, %v392_v41  ;;  %v1050_v46 = vpack.c.bf16 %v393_v42, %v393_v42  ;;  %v1237_v17 = vld [vmem:[%s1392_s2] ss:$0 sm:$0xff]  ;;  %v1242_v18 = vld [vmem:[%s1392_s2 + $0x3] ss:$0 sm:$0xff]  ;;  %v1247_v19 = vld [vmem:[%s1392_s2 + $0x2] ss:$0 sm:$0xff] }
  0x19   : > { %v1036_v39 = vld [vmem:[%s1392_s2 + $0x6] ss:$0 sm:$0xff] }
  0x1a   : > { %v394_v47 = vadd.f32 %v1029_v21, %v385_v43  ;;  %v412_v48 = vshrl.u32 %v1048_v44, 16  ;;  %v415_v49 = vshll.u32 %v1048_v44, 16  ;;  %v419_v50 = vshrl.u32 %v1049_v45, 16  ;;  %v459_v12 = vld [vmem:[#allocation2] sm:$0x3] }
  0x1b   : > { %v422_v51 = vshll.u32 %v1049_v45, 16  ;;  %v426_v52 = vshrl.u32 %v1050_v46, 16  ;;  %v429_v53 = vshll.u32 %v1050_v46, 16  ;;  %v510_v7 = vld [vmem:[#allocation2] sm:$0x7]  ;;  %v465_v16 = vunpack.c.l.bf16 %v459_v12 }
  0x1c   : > { %v1051_v54 = vpack.c.bf16 %v394_v47, %v394_v47  ;;  %v414_v55 = vrot.slane %v412_v48, 7  ;;  %v421_v57 = vrot.slane %v419_v50, 7  ;;  %v597_v10 = vld [vmem:[#allocation2] sm:$0x6]  ;;  %v516_v13 = vunpack.c.l.bf16 %v510_v7  ;;  %v1253_v21 = vld [vmem:[%s1392_s2 + $0x4] ss:$0 sm:$0xff] }
  0x1d   : > { %v428_v60 = vrot.slane %v426_v52, 7  ;;  %v603_v15 = vunpack.c.l.bf16 %v597_v10  ;;  %v464_v22 = vld [vmem:[#allocation2 + $0x14] sm:$0x3]  ;;  %v476_v34 = vmul.f32 %v1237_v17, %v465_v16  ;;  %v1272_v45 = vld [vmem:[%s1392_s2 + $0x7] ss:$0 sm:$0xff] }
  0x1e   : > { %v433_v61 = vshrl.u32 %v1051_v54, 16  ;;  %v436_v62 = vshll.u32 %v1051_v54, 16  ;;  %v417_v63 = vor.u32 %v415_v49, %v414_v55  ;;  %v424_v0 = vor.u32 %v422_v51, %v421_v57  ;;  %v1255_v23 = vld [vmem:[#allocation2 + $0x14] sm:$0x7]  ;;  %v1281_v52 = vld [vmem:[%s1392_s2 + $0x5] ss:$0 sm:$0xff] }
  0x1f   : > { %v431_v2 = vor.u32 %v429_v53, %v428_v60  ;;  %v527_v20 = vmul.f32 %v1232_v14, %v516_v13  ;;  %v1258_v33 = vmul.f32 %v1247_v19, %v603_v15  ;;  %v470_v37 = vunpack.c.l.bf16 %v464_v22  ;;  %v1291_v60 = vld [vmem:[%s1392_s2 + $0x8] ss:$0 sm:$0xff] }
  0x20   : > { %v435_v3 = vrot.slane %v433_v61, 7  ;;  %v448_v4 = vsel %vm1217_vm8, %v417_v63, %v447_v56  ;;  %v451_v5 = vsel %vm1217_vm8, %v424_v0, %v450_v59  ;;  %v521_v43 = vunpack.c.l.bf16 %v1255_v23 }
  0x21   : > { %449 = vst [vmem:[#allocation2 + $0x4] sm:$0x7] %v448_v4  ;;  %452 = vst [vmem:[#allocation2 + $0x8] sm:$0x7] %v451_v5  ;;  %v454_v8 = vsel %vm1217_vm8, %v431_v2, %v453_v1  ;;  %v535_v40 = vrot.slane %v527_v20, 1  ;;  %v622_v51 = vrot.slane %v1258_v33, 2  ;;  %v1286_v58 = vmul.f32 %v1036_v39, %v470_v37 }
  0x22   : > { %v438_v9 = vor.u32 %v436_v62, %v435_v3  ;;  %455 = vst [vmem:[#allocation2 + $0xc] sm:$0x7] %v454_v8 }
  0x24   : > { %v457_v11 = vsel %vm1217_vm8, %v438_v9, %v456_v6 }
  0x25   : > { %458 = vst [vmem:[#allocation2 + $0x10] sm:$0x7] %v457_v11 }
  0x28   : > { %v460_v24 = vld [vmem:[#allocation2 + $0x4] sm:$0x3]  ;;  %v461_v25 = vld [vmem:[#allocation2 + $0x8] sm:$0x3] }
  0x29   : > { %v511_v26 = vld [vmem:[#allocation2 + $0x4] sm:$0x7]  ;;  %v466_v27 = vunpack.c.l.bf16 %v460_v24  ;;  %v467_v28 = vunpack.c.l.bf16 %v461_v25  ;;  %v512_v29 = vld [vmem:[#allocation2 + $0x8] sm:$0x7]  ;;  %v462_v36 = vld [vmem:[#allocation2 + $0xc] sm:$0x3] }
  0x2a   : > { %v517_v30 = vunpack.c.l.bf16 %v511_v26  ;;  %v598_v31 = vld [vmem:[#allocation2 + $0x4] sm:$0x6]  ;;  %v599_v32 = vld [vmem:[#allocation2 + $0x8] sm:$0x6]  ;;  %v518_v35 = vunpack.c.l.bf16 %v512_v29  ;;  %v1265_v41 = vunpack.c.l.bf16 %v462_v36  ;;  %v513_v42 = vld [vmem:[#allocation2 + $0xc] sm:$0x7] }
  0x2b   : > { %v489_v38 = vmul.f32 %v1242_v18, %v466_v27  ;;  %v604_v46 = vunpack.c.l.bf16 %v598_v31  ;;  %v1274_v47 = vunpack.c.l.bf16 %v599_v32  ;;  %v477_v48 = vmul.f32 %v1237_v17, %v466_v27  ;;  %v600_v54 = vld [vmem:[#allocation2 + $0xc] sm:$0x6] }
  0x2c   : > { %v552_v44 = vmul.f32 %v1253_v21, %v517_v30  ;;  %v502_v50 = vmul.f32 %v1036_v39, %v467_v28  ;;  %v490_v53 = vmul.f32 %v1242_v18, %v467_v28  ;;  %v577_v55 = vmul.f32 %v1272_v45, %v518_v35  ;;  %v463_v4 = vld [vmem:[#allocation2 + $0x10] sm:$0x3] }
  0x2d   : > { %v493_v49 = vadd.f32 %v489_v38, %v476_v34  ;;  %v503_v56 = vmul.f32 %v1036_v39, %v1265_v41  ;;  %v519_v57 = vunpack.c.l.bf16 %v513_v42  ;;  %v528_v62 = vmul.f32 %v1232_v14, %v517_v30  ;;  %v514_v9 = vld [vmem:[#allocation2 + $0x10] sm:$0x7] }
  0x2e   : > { %v494_v61 = vadd.f32 %v490_v53, %v477_v48  ;;  %v553_v63 = vmul.f32 %v1253_v21, %v518_v35  ;;  %v560_v0 = vrot.slane %v552_v44, 1  ;;  %v639_v1 = vmul.f32 %v1281_v52, %v604_v46  ;;  %v601_v38 = vld [vmem:[#allocation2 + $0x10] sm:$0x6] }
  0x2f   : > { %v506_v59 = vadd.f32 %v502_v50, %v493_v49  ;;  %v664_v2 = vmul.f32 %v1291_v60, %v1274_v47  ;;  %v1298_v3 = vunpack.c.l.bf16 %v600_v54  ;;  %v536_v7 = vrot.slane %v528_v62, 1 }
  0x30   : > { %v507_v6 = vadd.f32 %v503_v56, %v494_v61  ;;  %v578_v8 = vmul.f32 %v1272_v45, %v519_v57  ;;  %v585_v10 = vrot.slane %v577_v55, 1  ;;  %v561_v11 = vrot.slane %v553_v63, 1 }
  0x31   : > { %v543_v5 = vadd.f32 %v535_v40, %v506_v59  ;;  %v615_v12 = vmul.f32 %v1247_v19, %v604_v46  ;;  %v640_v13 = vmul.f32 %v1281_v52, %v1274_v47  ;;  %v469_v20 = vunpack.c.l.bf16 %v463_v4 }
  0x32   : > { %v544_v16 = vadd.f32 %v536_v7, %v507_v6  ;;  %v478_v22 = vmul.f32 %v1237_v17, %v467_v28  ;;  %v665_v24 = vmul.f32 %v1291_v60, %v1298_v3  ;;  %v491_v25 = vmul.f32 %v1242_v18, %v1265_v41 }
  0x33   : > { %v568_v15 = vadd.f32 %v560_v0, %v543_v5  ;;  %v520_v26 = vunpack.c.l.bf16 %v514_v9  ;;  %v529_v27 = vmul.f32 %v1232_v14, %v518_v35  ;;  %v647_v30 = vrot.slane %v639_v1, 2  ;;  %v602_v5 = vld [vmem:[#allocation2 + $0x14] sm:$0x6] }
  0x34   : > { %v569_v31 = vadd.f32 %v561_v11, %v544_v16  ;;  %v586_v32 = vrot.slane %v578_v8, 1  ;;  %v672_v33 = vrot.slane %v664_v2, 2  ;;  %v495_v34 = vadd.f32 %v491_v25, %v478_v22 }
  0x35   : > { %v593_v29 = vadd.f32 %v585_v10, %v568_v15  ;;  %v504_v36 = vmul.f32 %v1036_v39, %v469_v20  ;;  %v554_v37 = vmul.f32 %v1253_v21, %v519_v57  ;;  %v623_v42 = vrot.slane %v615_v12, 2  ;;  %v1043_v39 = vld [vmem:[%s1393_s3] ss:$0 sm:$0xff] }
  0x36   : > { %v594_v40 = vadd.f32 %v586_v32, %v569_v31  ;;  %v648_v44 = vrot.slane %v640_v13, 2  ;;  %v673_v46 = vrot.slane %v665_v24, 2  ;;  %v537_v49 = vrot.slane %v529_v27, 1 }
  0x37   : > { %v630_v28 = vadd.f32 %v622_v51, %v593_v29  ;;  %v508_v48 = vadd.f32 %v504_v36, %v495_v34  ;;  %v579_v50 = vmul.f32 %v1272_v45, %v520_v26  ;;  %v607_v54 = vunpack.c.l.bf16 %v601_v38 }
  0x38   : > { %v631_v53 = vadd.f32 %v623_v42, %v594_v40  ;;  %v479_v55 = vmul.f32 %v1237_v17, %v1265_v41  ;;  %v562_v51 = vrot.slane %v554_v37, 1  ;;  %v616_v59 = vmul.f32 %v1247_v19, %v1274_v47 }
  0x39   : > { %v655_v35 = vadd.f32 %v647_v30, %v630_v28  ;;  %v545_v56 = vadd.f32 %v537_v49, %v508_v48  ;;  %v492_v61 = vmul.f32 %v1242_v18, %v469_v20  ;;  %v641_v0 = vmul.f32 %v1281_v52, %v1298_v3 }
  0x3a   : > { %v656_v63 = vadd.f32 %v648_v44, %v631_v53  ;;  %v530_v1 = vmul.f32 %v1232_v14, %v519_v57  ;;  %v587_v17 = vrot.slane %v579_v50, 1  ;;  %v555_v4 = vmul.f32 %v1253_v21, %v520_v26 }
  0x3b   : > { %v680_v62 = vadd.f32 %v672_v33, %v655_v35  ;;  %v570_v2 = vadd.f32 %v562_v51, %v545_v56  ;;  %v496_v41 = vadd.f32 %v492_v61, %v479_v55  ;;  %v666_v47 = vmul.f32 %v1291_v60, %v607_v54 }
  0x3c   : > { %v681_v7 = vadd.f32 %v673_v46, %v656_v63  ;;  %v580_v18 = vmul.f32 %v1272_v45, %v521_v43  ;;  %v624_v9 = vrot.slane %v616_v59, 2  ;;  %v538_v14 = vrot.slane %v530_v1, 1 }
  0x3d   : > { %v1324_v6 = vadd.f32 %v1043_v39, %v680_v62  ;;  %v595_v8 = vadd.f32 %v587_v17, %v570_v2  ;;  %v509_v10 = vadd.f32 %v1286_v58, %v496_v41  ;;  %v649_v21 = vrot.slane %v641_v0, 2 }
  0x3e   : > { %v1334_v11 = vadd.f32 %v1043_v39, %v681_v7  ;;  %v608_v12 = vunpack.c.l.bf16 %v602_v5  ;;  %v563_v16 = vrot.slane %v555_v4, 1  ;;  %v617_v23 = vmul.f32 %v1247_v19, %v1298_v3 }
  0x3f   : > { %v1332_v57 = vmul.f32 0.70710677, %v1324_v6  ;;  %v632_v13 = vadd.f32 %v624_v9, %v595_v8  ;;  %v546_v15 = vadd.f32 %v538_v14, %v509_v10  ;;  %v588_v58 = vrot.slane %v580_v18, 1 }
  0x40   : > { %v1340_v45 = vmul.f32 0.70710677, %v1334_v11  ;;  %v674_v22 = vrot.slane %v666_v47, 2  ;;  %v642_v25 = vmul.f32 %v1281_v52, %v607_v54  ;;  %v625_v31 = vrot.slane %v617_v23, 2 }
  0x41   : > { %v703_v43 = vand.u32 2147483647, %v1332_v57  ;;  %v657_v20 = vadd.f32 %v649_v21, %v632_v13  ;;  %v571_v24 = vadd.f32 %v563_v16, %v546_v15  ;;  %v667_v32 = vmul.f32 %v1291_v60, %v608_v12 }
  0x42   : > { %v704_v27 = vand.u32 2147483647, %v1340_v45  ;;  %v650_v36 = vrot.slane %v642_v25, 2  ;;  %vm779_vm9 = vcmp.ge.f32.partialorder %v1332_v57, 0.0  ;;  %vm780_vm10 = vcmp.ge.f32.partialorder %v1340_v45, 0.0 }
  0x43   : > { %v707_v26 = vmul.f32 0.3275911, %v703_v43  ;;  %v682_v29 = vadd.f32 %v674_v22, %v657_v20  ;;  %v596_v30 = vadd.f32 %v588_v58, %v571_v24  ;;  %v675_v28 = vrot.slane %v667_v32, 2 }
  0x44   : > { %v708_v3 = vmul.f32 0.3275911, %v704_v27  ;;  %v755_v60 = vsub.f32 0.0, %v703_v43  ;;  %v756_v50 = vsub.f32 0.0, %v704_v27 }
  0x45   : > { %v711_v19 = vadd.f32 1.0, %v707_v26  ;;  %v1345_v33 = vadd.f32 %v1043_v39, %v682_v29  ;;  %v633_v34 = vadd.f32 %v625_v31, %v596_v30 }
  0x46   : > { %v712_v37 = vadd.f32 1.0, %v708_v3  ;;  %v759_v54 = vmul.f32 %v755_v60, %v703_v43  ;;  %v760_v61 = vmul.f32 %v756_v50, %v704_v27  ;;  %v695_v50 = vmul.f32 0.5, %v1324_v6 }
  0x47   : > { %1077 = vrcp.f32 %v711_v19  ;;  %v1348_v38 = vmul.f32 0.70710677, %v1345_v33  ;;  %v658_v52 = vadd.f32 %v650_v36, %v633_v34  ;;  %v696_v6 = vmul.f32 0.5, %v1334_v11 }
  0x48   : > { %1079 = vrcp.f32 %v712_v37  ;;  %v763_v63 = vmul.f32 1.442695, %v759_v54  ;;  %v765_v41 = vmul.f32 1.442695, %v760_v61 }
  0x49   : > { %v705_v40 = vand.u32 2147483647, %v1348_v38  ;;  %v683_v42 = vadd.f32 %v675_v28, %v658_v52  ;;  %vm781_vm11 = vcmp.ge.f32.partialorder %v1348_v38, 0.0 }
  0x4b   : > { %v709_v44 = vmul.f32 0.3275911, %v705_v40  ;;  %v1351_v46 = vadd.f32 %v1043_v39, %v683_v42  ;;  %v757_v1 = vsub.f32 0.0, %v705_v40 }
  0x4d   : > { %v713_v48 = vadd.f32 1.0, %v709_v44  ;;  %v1354_v49 = vmul.f32 0.70710677, %v1351_v46  ;;  %v761_v47 = vmul.f32 %v757_v1, %v705_v40 }
  0x4f   : > { %1081 = vrcp.f32 %v713_v48  ;;  %v706_v35 = vand.u32 2147483647, %v1354_v49  ;;  %v767_v13 = vmul.f32 1.442695, %v761_v47  ;;  %v697_v47 = vmul.f32 0.5, %v1345_v33 }
  0x50   : > { %vm782_vm12 = vcmp.ge.f32.partialorder %v1354_v49, 0.0 }
  0x51   : > { %v1078_v53 = vpop.eup %1077  ;;  %v710_v56 = vmul.f32 0.3275911, %v706_v35  ;;  %v758_v10 = vsub.f32 0.0, %v706_v35 }
  0x52   : > { %v719_v55 = vmul.f32 1.0614054, %v1078_v53  ;;  %v1080_v51 = vpop.eup %1079 }
  0x53   : > { %v714_v62 = vadd.f32 1.0, %v710_v56  ;;  %v720_v39 = vmul.f32 1.0614054, %v1080_v51  ;;  %v762_v58 = vmul.f32 %v758_v10, %v706_v35 }
  0x54   : > { %v723_v59 = vadd.f32 -1.4531521, %v719_v55 }
  0x55   : > { %1083 = vrcp.f32 %v714_v62  ;;  %v724_v2 = vadd.f32 -1.4531521, %v720_v39  ;;  %v769_v32 = vmul.f32 1.442695, %v762_v58 }
  0x56   : > { %v727_v0 = vmul.f32 %v1078_v53, %v723_v59  ;;  %1085 = vpow2.f32 %v763_v63 }
  0x57   : > { %v728_v4 = vmul.f32 %v1080_v51, %v724_v2  ;;  %1087 = vpow2.f32 %v765_v41 }
  0x58   : > { %v731_v17 = vadd.f32 1.4214138, %v727_v0  ;;  %1089 = vpow2.f32 %v767_v13  ;;  %v698_v13 = vmul.f32 0.5, %v1351_v46 }
  0x59   : > { %v1082_v5 = vpop.eup %1081  ;;  %v732_v18 = vadd.f32 1.4214138, %v728_v4  ;;  %1091 = vpow2.f32 %v769_v32 }
  0x5a   : > { %v735_v7 = vmul.f32 %v1078_v53, %v731_v17  ;;  %v721_v8 = vmul.f32 1.0614054, %v1082_v5 }
  0x5b   : > { %v736_v14 = vmul.f32 %v1080_v51, %v732_v18 }
  0x5c   : > { %v739_v9 = vadd.f32 -0.28449672, %v735_v7  ;;  %v725_v21 = vadd.f32 -1.4531521, %v721_v8 }
  0x5d   : > { %v740_v15 = vadd.f32 -0.28449672, %v736_v14 }
  0x5e   : > { %v743_v12 = vmul.f32 %v1078_v53, %v739_v9  ;;  %v729_v16 = vmul.f32 %v1082_v5, %v725_v21 }
  0x5f   : > { %v1084_v23 = vpop.eup %1083  ;;  %v744_v20 = vmul.f32 %v1080_v51, %v740_v15 }
  0x60   : > { %v747_v43 = vadd.f32 0.2548296, %v743_v12  ;;  %v733_v22 = vadd.f32 1.4214138, %v729_v16  ;;  %v722_v24 = vmul.f32 1.0614054, %v1084_v23  ;;  %v1086_v26 = vpop.eup %1085 }
  0x61   : > { %v748_v27 = vadd.f32 0.2548296, %v744_v20  ;;  %v1088_v36 = vpop.eup %1087 }
  0x62   : > { %v751_v25 = vmul.f32 %v1078_v53, %v747_v43  ;;  %v737_v29 = vmul.f32 %v1082_v5, %v733_v22  ;;  %v726_v30 = vadd.f32 -1.4531521, %v722_v24 }
  0x63   : > { %v752_v19 = vmul.f32 %v1080_v51, %v748_v27  ;;  %v1090_v51 = vpop.eup %1089 }
  0x64   : > { %v771_v31 = vmul.f32 %v1086_v26, %v751_v25  ;;  %v741_v3 = vadd.f32 -0.28449672, %v737_v29  ;;  %v730_v34 = vmul.f32 %v1084_v23, %v726_v30  ;;  %v1092_v41 = vpop.eup %1091 }
  0x65   : > { %v772_v52 = vmul.f32 %v1088_v36, %v752_v19 }
  0x66   : > { %v775_v37 = vsub.f32 1.0, %v771_v31  ;;  %v745_v28 = vmul.f32 %v1082_v5, %v741_v3  ;;  %v734_v40 = vadd.f32 1.4214138, %v730_v34 }
  0x67   : > { %v776_v44 = vsub.f32 1.0, %v772_v52 }
  0x68   : > { %v783_v42 = vsub.f32 0.0, %v775_v37  ;;  %v749_v60 = vadd.f32 0.2548296, %v745_v28  ;;  %v738_v48 = vmul.f32 %v1084_v23, %v734_v40 }
  0x69   : > { %v784_v54 = vsub.f32 0.0, %v776_v44 }
  0x6a   : > { %v787_v35 = vsel %vm779_vm9, %v775_v37, %v783_v42  ;;  %v753_v55 = vmul.f32 %v1082_v5, %v749_v60  ;;  %v742_v56 = vadd.f32 -0.28449672, %v738_v48 }
  0x6b   : > { %v791_v53 = vadd.f32 1.0, %v787_v35  ;;  %v788_v61 = vsel %vm780_vm10, %v776_v44, %v784_v54 }
  0x6c   : > { %v773_v62 = vmul.f32 %v1090_v51, %v753_v55  ;;  %v746_v63 = vmul.f32 %v1084_v23, %v742_v56  ;;  %v792_v57 = vadd.f32 1.0, %v788_v61 }
  0x6d   : > { %v795_v59 = vmul.f32 %v791_v53, %v695_v50 }
  0x6e   : > { %v777_v0 = vsub.f32 1.0, %v773_v62  ;;  %v750_v1 = vadd.f32 0.2548296, %v746_v63  ;;  %v796_v2 = vmul.f32 %v792_v57, %v696_v6 }
  0x6f   : > { %v799_v39 = vpack.c.bf16 %v795_v59, %v795_v59 }
  0x70   : > { %v785_v45 = vsub.f32 0.0, %v777_v0  ;;  %v754_v17 = vmul.f32 %v1084_v23, %v750_v1  ;;  %v800_v4 = vpack.c.bf16 %v796_v2, %v796_v2 }
  0x71   : > { %803 = vst [vmem:[%s1365_s7] sm:$0x3] %v799_v39  ;;  %v807_v21 = vunpack.c.l.bf16 %v799_v39 }
  0x72   : > { %v789_v5 = vsel %vm781_vm11, %v777_v0, %v785_v45  ;;  %v774_v7 = vmul.f32 %v1092_v41, %v754_v17  ;;  %804 = vst [vmem:[%s1365_s7 + $0x2] sm:$0x3] %v800_v4  ;;  %v808_v12 = vunpack.c.l.bf16 %v800_v4 }
  0x73   : > { %v793_v18 = vadd.f32 1.0, %v789_v5  ;;  %v826_v23 = vmul.f32 %v807_v21, %v807_v21 }
  0x74   : > { %v778_v11 = vsub.f32 1.0, %v774_v7  ;;  %v827_v43 = vmul.f32 %v808_v12, %v808_v12  ;;  %v815_v58 = vcombine.low %v807_v21, %v808_v12 }
  0x75   : > { %v797_v8 = vmul.f32 %v793_v18, %v697_v47 }
  0x76   : > { %v786_v9 = vsub.f32 0.0, %v778_v11  ;;  %v834_v24 = vcombine.low %v826_v23, %v827_v43 }
  0x77   : > { %v801_v10 = vpack.c.bf16 %v797_v8, %v797_v8 }
  0x78   : > { %v790_v14 = vsel %vm782_vm12, %v778_v11, %v786_v9 }
  0x79   : > { %805 = vst [vmem:[%s1365_s7 + $0x4] sm:$0x3] %v801_v10  ;;  %v794_v38 = vadd.f32 1.0, %v790_v14  ;;  %v809_v15 = vunpack.c.l.bf16 %v801_v10 }
  0x7b   : > { %v798_v16 = vmul.f32 %v794_v38, %v698_v13  ;;  %v828_v20 = vmul.f32 %v809_v15, %v809_v15 }
  0x7d   : > { %v802_v33 = vpack.c.bf16 %v798_v16, %v798_v16 }
  0x7f   : > { %806 = vst [vmem:[%s1365_s7 + $0x6] sm:$0x3] %v802_v33  ;;  %v810_v22 = vunpack.c.l.bf16 %v802_v33 }
  0x81   : > { %v816_v25 = vcombine.low %v809_v15, %v810_v22  ;;  %v829_v49 = vmul.f32 %v810_v22, %v810_v22 }
  0x83   : > { %v819_v26 = vadd.f32 %v816_v25, %v815_v58  ;;  %v835_v27 = vcombine.low %v828_v20, %v829_v49 }
  0x85   : > { %v820_v29 = vrot.slane %v819_v26, 4  ;;  %v838_v30 = vadd.f32 %v835_v27, %v834_v24 }
  0x87   : > { %v821_v31 = vadd.f32 %v820_v29, %v819_v26  ;;  %v839_v46 = vrot.slane %v838_v30, 4 }
  0x89   : > { %v822_v32 = vrot.slane %v821_v31, 2  ;;  %v840_v19 = vadd.f32 %v839_v46, %v838_v30 }
  0x8b   : > { %v823_v3 = vadd.f32 %v822_v32, %v821_v31  ;;  %v841_v34 = vrot.slane %v840_v19, 2 }
  0x8d   : > { %v824_v36 = vrot.slane %v823_v3, 1  ;;  %v842_v37 = vadd.f32 %v841_v34, %v840_v19 }
  0x8f   : > { %v843_v52 = vrot.slane %v842_v37, 1  ;;  %v825_v28 = vadd.f32 %v824_v36, %v823_v3 }
  0x91   : > { %v844_v40 = vadd.f32 %v843_v52, %v842_v37 }
  0x93   : > { %v846_v42 = vsel %vm327_vm0, %v825_v28, %v844_v40 }
  0x94   : > { %847 = vst [vmem:[%s322_s10] sm:$0x3] %v846_v42 }
  0x95 PF: > { %s16_s20 = sadd.s32 1, %s1115_s20   ;;  %s1402_s18 = smov %s1111_s19 }
  0x96   : > { %p13_p5 = scmp.ge.s32.totalorder %s16_s20, 4   ;;  %s1403_s19 = smov %s1405_s21 }
  0x98   :  { %15 = sbr.rel (!%p13_p5) target bundleno = 2 (0x2), region = 89 }

// kernel: convmixer_forward.6
= control target key start
LH: loop header
LB: loop body
LE: loop exit
PB: predicated region body
PF: predicated region fallthrough
CT: control target
= control target key end

     0   :  { %vm375_vm4 = vcmask 1040384   ;;  %s637_s1 = inlined_call_operand.vmem [shape: bf16[256,128], index: 1, kind: input, shape index: {}]   ;;  %s638_s0 = inlined_call_operand.vmem [shape: bf16[32,256], index: 0, kind: input, shape index: {}]   ;;  %s639_s2 = inlined_call_operand.vmem [shape: f32[1,128], index: 2, kind: input, shape index: {}]   ;;  %s640_s3 = inlined_call_operand.vmem [shape: bf16[32,128], index: 3, kind: output, shape index: {0}]   ;;  %s641_s4 = inlined_call_operand.vmem [shape: f32[1,2,128], index: 4, kind: output, shape index: {1}]  }
   0x1   :  { %v470_v0 = vld [vmem:[%s637_s1 + $0x40] sm:$0xff]   ;;  %v472_v2 = vld [vmem:[%s637_s1 + $0x48] sm:$0xff]   ;;  %v474_v4 = vld [vmem:[%s637_s1 + $0x50] sm:$0xff]  }
   0x2   :  { %v471_v1 = vld [vmem:[%s637_s1] sm:$0xff]   ;;  %426 = vmatprep.subr.bf16.mxu0 %v470_v0  ;;  %454 = vmatprep.subr.bf16.mxu1 %v470_v0  ;;  %v473_v3 = vld [vmem:[%s637_s1 + $0x8] sm:$0xff]   ;;  %v475_v5 = vld [vmem:[%s637_s1 + $0x10] sm:$0xff]  }
   0x3   :  { %427 = vmatpush3.bf16.msra.mxu0 %v471_v1  ;;  %462 = vmatpush3.bf16.msra.mxu1 %v471_v1  ;;  %v476_v6 = vld [vmem:[%s637_s1 + $0x58] sm:$0xff]   ;;  %v478_v8 = vld [vmem:[%s637_s1 + $0x60] sm:$0xff]   ;;  %v480_v10 = vld [vmem:[%s637_s1 + $0x68] sm:$0xff]  }
   0x4   :  { %428 = vmatprep.subr.bf16.mxu0 %v472_v2  ;;  %455 = vmatprep.subr.bf16.mxu1 %v472_v2  ;;  %v477_v7 = vld [vmem:[%s637_s1 + $0x18] sm:$0xff]   ;;  %v479_v9 = vld [vmem:[%s637_s1 + $0x20] sm:$0xff]   ;;  %v481_v13 = vld [vmem:[%s637_s1 + $0x28] sm:$0xff]  }
   0x5   :  { %v488_v11 = vld [vmem:[%s638_s0 + $0x4] ss:$8 sps:$4 sm:$0xff]   ;;  %v491_v12 = vld [vmem:[%s638_s0 + $0x14] ss:$8 sps:$4 sm:$0xff]   ;;  %v486_v18 = vld [vmem:[%s638_s0] ss:$8 sps:$4 sm:$0xff]  }
   0x6   :  { %v482_v14 = vld [vmem:[%s637_s1 + $0x70] sm:$0xff]   ;;  %208 = vmatprep.mubr.bf16.mxu0 %v488_v11  ;;  %216 = vmatprep.mubr.bf16.mxu1 %v491_v12  ;;  %v484_v16 = vld [vmem:[%s637_s1 + $0x78] sm:$0xff]   ;;  %v386_v22 = vld [vmem:[%s639_s2] ss:$0 sm:$0xff] }
   0x7   :  { %429 = vmatpush3.bf16.msra.mxu0 %v473_v3  ;;  %463 = vmatpush3.bf16.msra.mxu1 %v473_v3  ;;  %v483_v15 = vld [vmem:[%s637_s1 + $0x30] sm:$0xff]   ;;  %v485_v17 = vld [vmem:[%s637_s1 + $0x38] sm:$0xff]  }
   0x8   :  { %430 = vmatprep.subr.bf16.mxu0 %v474_v4  ;;  %456 = vmatprep.subr.bf16.mxu1 %v474_v4  ;;  %v489_v19 = vld [vmem:[%s638_s0 + $0x10] ss:$8 sps:$4 sm:$0xff]  }
   0xb   :  { %431 = vmatpush3.bf16.msra.mxu0 %v475_v5  ;;  %464 = vmatpush3.bf16.msra.mxu1 %v475_v5 }
   0xc   :  { %432 = vmatprep.subr.bf16.mxu0 %v476_v6  ;;  %457 = vmatprep.subr.bf16.mxu1 %v476_v6 }
   0xf   :  { %433 = vmatpush3.bf16.msra.mxu0 %v477_v7  ;;  %465 = vmatpush3.bf16.msra.mxu1 %v477_v7 }
  0x10   :  { %434 = vmatprep.subr.bf16.mxu0 %v478_v8  ;;  %458 = vmatprep.subr.bf16.mxu1 %v478_v8 }
  0x13   :  { %435 = vmatpush3.bf16.msra.mxu0 %v479_v9  ;;  %466 = vmatpush3.bf16.msra.mxu1 %v479_v9 }
  0x14   :  { %436 = vmatprep.subr.bf16.mxu0 %v480_v10  ;;  %459 = vmatprep.subr.bf16.mxu1 %v480_v10 }
  0x17   :  { %437 = vmatpush3.bf16.msra.mxu0 %v481_v13  ;;  %467 = vmatpush3.bf16.msra.mxu1 %v481_v13 }
  0x18   :  { %438 = vmatprep.subr.bf16.mxu0 %v482_v14  ;;  %460 = vmatprep.subr.bf16.mxu1 %v482_v14 }
  0x1b   :  { %439 = vmatpush3.bf16.msra.mxu0 %v483_v15  ;;  %468 = vmatpush3.bf16.msra.mxu1 %v483_v15 }
  0x1c   :  { %440 = vmatprep.subr.bf16.mxu0 %v484_v16  ;;  %461 = vmatprep.subr.bf16.mxu1 %v484_v16 }
  0x1f   :  { %441 = vmatpush3.bf16.msra.mxu0 %v485_v17  ;;  %469 = vmatpush3.bf16.msra.mxu1 %v485_v17 }
  0x22   :  { %209 = vmatmul.mubr.bf16.vlgmr.msra.gmra.mrb[0].mxu0 %v486_v18  ;;  %217 = vmatmul.mubr.bf16.vlgmr.msra.gmra.mrb[0].mxu1 %v489_v19 }
  0xf5   :  { %v442_v20 = vpop.f32.mrb[0].mxu0  ;;  %v448_v21 = vpop.f32.mrb[0].mxu1 }
  0xf6   :  { %v443_v23 = vpop.f32.mrb[1].mxu0  ;;  %v449_v24 = vpop.f32.mrb[1].mxu1 }
  0xf7   :  { %v444_v25 = vadd.f32 %v443_v23, %v442_v20  ;;  %v450_v26 = vadd.f32 %v449_v24, %v448_v21  ;;  %v445_v27 = vpop.f32.mrb[2].mxu0  ;;  %v451_v28 = vpop.f32.mrb[2].mxu1 }
  0xf8   :  { %v446_v29 = vpop.f32.mrb[3].mxu0  ;;  %v452_v30 = vpop.f32.mrb[3].mxu1 }
  0xf9   :  { %v596_v31 = vadd.f32 %v444_v25, %v386_v22  ;;  %v598_v32 = vadd.f32 %v450_v26, %v386_v22  ;;  %v447_v33 = vadd.f32 %v446_v29, %v445_v27  ;;  %v453_v34 = vadd.f32 %v452_v30, %v451_v28 }
  0xfb   :  { %v601_v35 = vmul.f32 0.70710677, %v596_v31  ;;  %v604_v36 = vmul.f32 0.70710677, %v598_v32  ;;  %v606_v37 = vadd.f32 %v447_v33, %v386_v22  ;;  %v608_v38 = vadd.f32 %v453_v34, %v386_v22 }
  0xfd   :  { %v233_v39 = vand.u32 2147483647, %v601_v35  ;;  %v235_v40 = vand.u32 2147483647, %v604_v36  ;;  %v613_v41 = vmul.f32 0.70710677, %v606_v37 }
  0xfe   :  { %v616_v42 = vmul.f32 0.70710677, %v608_v38  ;;  %vm309_vm0 = vcmp.ge.f32.partialorder %v601_v35, 0.0  ;;  %vm311_vm1 = vcmp.ge.f32.partialorder %v604_v36, 0.0 }
  0xff   :  { %v237_v43 = vmul.f32 0.3275911, %v233_v39  ;;  %v239_v44 = vmul.f32 0.3275911, %v235_v40  ;;  %v234_v45 = vand.u32 2147483647, %v613_v41 }
 0x100   :  { %v236_v46 = vand.u32 2147483647, %v616_v42  ;;  %v285_v53 = vsub.f32 0.0, %v233_v39  ;;  %v287_v54 = vsub.f32 0.0, %v235_v40  ;;  %vm310_vm2 = vcmp.ge.f32.partialorder %v613_v41, 0.0 }
 0x101   :  { %v241_v47 = vadd.f32 1.0, %v237_v43  ;;  %v243_v48 = vadd.f32 1.0, %v239_v44  ;;  %v238_v49 = vmul.f32 0.3275911, %v234_v45  ;;  %v286_v57 = vsub.f32 0.0, %v234_v45 }
 0x102   :  { %v240_v50 = vmul.f32 0.3275911, %v236_v46  ;;  %v289_v56 = vmul.f32 %v285_v53, %v233_v39  ;;  %v291_v60 = vmul.f32 %v287_v54, %v235_v40  ;;  %v288_v62 = vsub.f32 0.0, %v236_v46 }
 0x103   :  { %492 = vrcp.f32 %v241_v47  ;;  %v242_v51 = vadd.f32 1.0, %v238_v49  ;;  %v290_v3 = vmul.f32 %v286_v57, %v234_v45  ;;  %vm312_vm3 = vcmp.ge.f32.partialorder %v616_v42, 0.0 }
 0x104   :  { %494 = vrcp.f32 %v243_v48  ;;  %v244_v52 = vadd.f32 1.0, %v240_v50  ;;  %v293_v1 = vmul.f32 1.442695, %v289_v56  ;;  %v297_v5 = vmul.f32 1.442695, %v291_v60 }
 0x105   :  { %496 = vrcp.f32 %v242_v51  ;;  %v292_v9 = vmul.f32 %v288_v62, %v236_v46  ;;  %v295_v14 = vmul.f32 1.442695, %v290_v3 }
 0x106   :  { %498 = vrcp.f32 %v244_v52 }
 0x107   :  { %500 = vpow2.f32 %v293_v1  ;;  %v299_v19 = vmul.f32 1.442695, %v292_v9 }
 0x108   :  { %502 = vpow2.f32 %v297_v5 }
 0x109   :  { %504 = vpow2.f32 %v295_v14 }
 0x10a   :  { %506 = vpow2.f32 %v299_v19 }
 0x10d   :  { %v493_v55 = vpop.eup %492 }
 0x10e   :  { %v495_v58 = vpop.eup %494  ;;  %v249_v59 = vmul.f32 1.0614054, %v493_v55 }
 0x10f   :  { %v251_v61 = vmul.f32 1.0614054, %v495_v58  ;;  %v497_v0 = vpop.eup %496 }
 0x110   :  { %v253_v63 = vadd.f32 -1.4531521, %v249_v59  ;;  %v250_v6 = vmul.f32 1.0614054, %v497_v0  ;;  %v499_v7 = vpop.eup %498 }
 0x111   :  { %v255_v2 = vadd.f32 -1.4531521, %v251_v61  ;;  %v252_v12 = vmul.f32 1.0614054, %v499_v7  ;;  %v501_v43 = vpop.eup %500 }
 0x112   :  { %v257_v4 = vmul.f32 %v493_v55, %v253_v63  ;;  %v254_v11 = vadd.f32 -1.4531521, %v250_v6  ;;  %v503_v45 = vpop.eup %502 }
 0x113   :  { %v259_v8 = vmul.f32 %v495_v58, %v255_v2  ;;  %v256_v17 = vadd.f32 -1.4531521, %v252_v12  ;;  %v505_v53 = vpop.eup %504 }
 0x114   :  { %v261_v10 = vadd.f32 1.4214138, %v257_v4  ;;  %v258_v16 = vmul.f32 %v497_v0, %v254_v11  ;;  %v507_v60 = vpop.eup %506  ;;  %v228_v11 = vmul.f32 0.5, %v608_v38 }
 0x115   :  { %v263_v13 = vadd.f32 1.4214138, %v259_v8  ;;  %v260_v22 = vmul.f32 %v499_v7, %v256_v17  ;;  %v227_v8 = vmul.f32 0.5, %v598_v32 }
 0x116   :  { %v265_v15 = vmul.f32 %v493_v55, %v261_v10  ;;  %v262_v21 = vadd.f32 1.4214138, %v258_v16 }
 0x117   :  { %v267_v18 = vmul.f32 %v495_v58, %v263_v13  ;;  %v264_v26 = vadd.f32 1.4214138, %v260_v22 }
 0x118   :  { %v269_v20 = vadd.f32 -0.28449672, %v265_v15  ;;  %v266_v25 = vmul.f32 %v497_v0, %v262_v21 }
 0x119   :  { %v271_v23 = vadd.f32 -0.28449672, %v267_v18  ;;  %v268_v30 = vmul.f32 %v499_v7, %v264_v26 }
 0x11a   :  { %v273_v24 = vmul.f32 %v493_v55, %v269_v20  ;;  %v270_v29 = vadd.f32 -0.28449672, %v266_v25 }
 0x11b   :  { %v275_v27 = vmul.f32 %v495_v58, %v271_v23  ;;  %v272_v40 = vadd.f32 -0.28449672, %v268_v30 }
 0x11c   :  { %v277_v28 = vadd.f32 0.2548296, %v273_v24  ;;  %v274_v39 = vmul.f32 %v497_v0, %v270_v29 }
 0x11d   :  { %v279_v33 = vadd.f32 0.2548296, %v275_v27  ;;  %v276_v48 = vmul.f32 %v499_v7, %v272_v40 }
 0x11e   :  { %v281_v34 = vmul.f32 %v493_v55, %v277_v28  ;;  %v278_v47 = vadd.f32 0.2548296, %v274_v39 }
 0x11f   :  { %v283_v44 = vmul.f32 %v495_v58, %v279_v33  ;;  %v280_v52 = vadd.f32 0.2548296, %v276_v48 }
 0x120   :  { %v301_v46 = vmul.f32 %v501_v43, %v281_v34  ;;  %v282_v51 = vmul.f32 %v497_v0, %v278_v47  ;;  %v225_v0 = vmul.f32 0.5, %v596_v31 }
 0x121   :  { %v303_v49 = vmul.f32 %v503_v45, %v283_v44  ;;  %v284_v59 = vmul.f32 %v499_v7, %v280_v52  ;;  %v226_v7 = vmul.f32 0.5, %v606_v37 }
 0x122   :  { %v305_v50 = vsub.f32 1.0, %v301_v46  ;;  %v302_v57 = vmul.f32 %v505_v53, %v282_v51 }
 0x123   :  { %v307_v54 = vsub.f32 1.0, %v303_v49  ;;  %v304_v58 = vmul.f32 %v507_v60, %v284_v59 }
 0x124   :  { %v313_v56 = vsub.f32 0.0, %v305_v50  ;;  %v306_v62 = vsub.f32 1.0, %v302_v57 }
 0x125   :  { %v315_v55 = vsub.f32 0.0, %v307_v54  ;;  %v308_v2 = vsub.f32 1.0, %v304_v58 }
 0x126   :  { %v317_v61 = vsel %vm309_vm0, %v305_v50, %v313_v56  ;;  %v314_v1 = vsub.f32 0.0, %v306_v62 }
 0x127   :  { %v319_v63 = vsel %vm311_vm1, %v307_v54, %v315_v55  ;;  %v321_v3 = vadd.f32 1.0, %v317_v61  ;;  %v316_v5 = vsub.f32 0.0, %v308_v2 }
 0x128   :  { %v318_v4 = vsel %vm310_vm2, %v306_v62, %v314_v1  ;;  %v323_v6 = vadd.f32 1.0, %v319_v63 }
 0x129   :  { %v322_v35 = vadd.f32 1.0, %v318_v4  ;;  %v320_v9 = vsel %vm312_vm3, %v308_v2, %v316_v5  ;;  %v325_v36 = vmul.f32 %v321_v3, %v225_v0 }
 0x12a   :  { %v324_v12 = vadd.f32 1.0, %v320_v9  ;;  %v327_v13 = vmul.f32 %v323_v6, %v227_v8 }
 0x12b   :  { %v326_v10 = vmul.f32 %v322_v35, %v226_v7 }
 0x12c   :  { %v328_v14 = vmul.f32 %v324_v12, %v228_v11 }
 0x12d   :  { %v329_v41 = vpack.c.bf16 %v326_v10, %v325_v36 }
 0x12e   :  { %v330_v15 = vpack.c.bf16 %v328_v14, %v327_v13 }
 0x12f   :  { %419 = vst [vmem:[%s640_s3] sm:$0xff] %v329_v41   ;;  %v349_v31 = vunpack.c.l.bf16 %v329_v41  ;;  %v350_v37 = vunpack.c.h.bf16 %v329_v41 }
 0x130   :  { %425 = vst [vmem:[%s640_s3 + $0x8] sm:$0xff] %v330_v15   ;;  %v351_v32 = vunpack.c.l.bf16 %v330_v15  ;;  %v352_v38 = vunpack.c.h.bf16 %v330_v15 }
 0x131   :  { %v353_v16 = vadd.f32 %v350_v37, %v349_v31  ;;  %v362_v42 = vmul.f32 %v349_v31, %v349_v31  ;;  %v363_v17 = vmul.f32 %v350_v37, %v350_v37 }
 0x132   :  { %v364_v20 = vmul.f32 %v351_v32, %v351_v32  ;;  %v365_v22 = vmul.f32 %v352_v38, %v352_v38 }
 0x133   :  { %v366_v18 = vadd.f32 %v363_v17, %v362_v42  ;;  %v354_v19 = vadd.f32 %v353_v16, %v351_v32 }
 0x135   :  { %v355_v21 = vadd.f32 %v354_v19, %v352_v38  ;;  %v367_v23 = vadd.f32 %v366_v18, %v364_v20 }
 0x137   :  { %v356_v24 = vrot.slane %v355_v21, 4  ;;  %v368_v25 = vadd.f32 %v367_v23, %v365_v22 }
 0x139   :  { %v357_v26 = vadd.f32 %v356_v24, %v355_v21  ;;  %v369_v27 = vrot.slane %v368_v25, 4 }
 0x13b   :  { %v358_v28 = vrot.slane %v357_v26, 2  ;;  %v370_v29 = vadd.f32 %v369_v27, %v368_v25 }
 0x13d   :  { %v359_v30 = vadd.f32 %v358_v28, %v357_v26  ;;  %v371_v33 = vrot.slane %v370_v29, 2 }
 0x13f   :  { %v360_v34 = vrot.slane %v359_v30, 1  ;;  %v372_v39 = vadd.f32 %v371_v33, %v370_v29 }
 0x141   :  { %v373_v40 = vrot.slane %v372_v39, 1  ;;  %v361_v43 = vadd.f32 %v360_v34, %v359_v30 }
 0x143   :  { %v374_v44 = vadd.f32 %v373_v40, %v372_v39 }
 0x145   :  { %v376_v45 = vsel %vm375_vm4, %v361_v43, %v374_v44 }
 0x146   :  { %377 = vst [vmem:[%s641_s4] sm:$0x3] %v376_v45 }

// kernel: convmixer_forward.11
= control target key start
LH: loop header
LB: loop body
LE: loop exit
PB: predicated region body
PF: predicated region fallthrough
CT: control target
= control target key end

     0   :  { %v288_v1 = vmov 0.0   ;;  %vm289_vm0 = vmmov 0   ;;  %s367_s0 = inlined_call_operand.vmem [shape: bf16[2,16,128], index: 0, kind: input, shape index: {}]   ;;  %s368_s1 = inlined_call_operand.vmem [shape: f32[2,128], index: 1, kind: input, shape index: {}]   ;;  %s369_s2 = inlined_call_operand.vmem [shape: bf16[128,128], index: 2, kind: input, shape index: {}]   ;;  %s370_s3 = inlined_call_operand.vmem [shape: f32[1,128], index: 3, kind: input, shape index: {}]   ;;  %s371_s4 = inlined_call_operand.hbm [shape: f32[2,128], index: 4, kind: output, shape index: {}]  }
   0x1   :  { %v256_v0 = vld [vmem:[%s369_s2] sm:$0xff]   ;;  %233 = vmatprep.subr.bf16.mxu0 %v288_v1  ;;  %23 = vst [vmem:[#allocation2] sm:$0x3] %v288_v1  ;;  %v257_v2 = vld [vmem:[%s369_s2 + $0x8] sm:$0xff]   ;;  %249 = vmatprep.mubr.msk.bf16.mxu0 %vm289_vm0, %v288_v1  ;;  %v258_v3 = vld [vmem:[%s369_s2 + $0x10] sm:$0xff]  }
   0x2   :  { %234 = vmatpush3.bf16.msra.mxu0 %v256_v0  ;;  %v216_v4 = vld [vmem:[%s367_s0] sm:$0xff]   ;;  %v223_v5 = vld [vmem:[%s367_s0 + $0x8] sm:$0xff]   ;;  %v259_v11 = vld [vmem:[%s369_s2 + $0x18] sm:$0xff]  }
   0x3   :  { %235 = vmatprep.subr.bf16.mxu0 %v288_v1  ;;  %v204_v6 = vld [vmem:[%s368_s1] ss:$0 sm:$0xff]  ;;  %v217_v7 = vunpack.c.l.bf16 %v216_v4  ;;  %v218_v8 = vunpack.c.h.bf16 %v216_v4  ;;  %v221_v9 = vunpack.c.l.bf16 %v223_v5  ;;  %v222_v10 = vunpack.c.h.bf16 %v223_v5  ;;  %v205_v12 = vld [vmem:[%s368_s1 + $0x1] ss:$0 sm:$0xff] }
   0x6   :  { %236 = vmatpush3.bf16.msra.mxu0 %v257_v2 }
   0x7   :  { %237 = vmatprep.subr.bf16.mxu0 %v288_v1 }
   0xa   :  { %238 = vmatpush3.bf16.msra.mxu0 %v258_v3 }
   0xb   :  { %9 = vsyncpa [#allocation4], 0  ;;  %239 = vmatprep.subr.bf16.mxu0 %v288_v1  ;;  %v37_v13 = vmul.f32 %v217_v7, %v204_v6  ;;  %v38_v14 = vmul.f32 %v218_v8, %v204_v6  ;;  %v39_v15 = vmul.f32 %v221_v9, %v204_v6  ;;  %v40_v16 = vmul.f32 %v222_v10, %v204_v6  ;;  %v260_v21 = vld [vmem:[%s369_s2 + $0x20] sm:$0xff]   ;;  %v261_v26 = vld [vmem:[%s369_s2 + $0x28] sm:$0xff]   ;;  %s290_s13 = smov [#allocation3]  }
   0xc   :  { %v262_v31 = vld [vmem:[%s369_s2 + $0x30] sm:$0xff]   ;;  %v263_v36 = vld [vmem:[%s369_s2 + $0x38] sm:$0xff]   ;;  %vm67_vm1 = vcmask 1041409   ;;  %v50_v37 = vld [vmem:[#allocation2] sm:$0x3]  ;;  %s196_s14 = sshll.u32 %s290_s13, 4  ;;  %s197_s14 = int_to_ptr.vmem [resolvable:$true] %s196_s14 }
   0xd   :  { %v46_v17 = vadd.f32 %v205_v12, %v37_v13  ;;  %v47_v18 = vadd.f32 %v205_v12, %v38_v14  ;;  %v48_v19 = vadd.f32 %v205_v12, %v39_v15  ;;  %v49_v20 = vadd.f32 %v205_v12, %v40_v16  ;;  %v206_v45 = vld [vmem:[%s370_s3] ss:$0 sm:$0xff]  ;;  %s264_s2 = scalar_lea.vmem %s197_s14, 32  ;;  %p269_p1 = scmp.lt.s32.totalorder %s197_s14, %s197_s14 }
   0xe   :  { %240 = vmatpush3.bf16.msra.mxu0 %v259_v11  ;;  %p265_p0 = scmp.ne.s32.totalorder %s197_s14, %s264_s2  ;;  %p270_p2 = scmp.lt.s32.totalorder %s264_s2, %s264_s2 }
   0xf   :  { %241 = vmatprep.subr.bf16.mxu0 %v288_v1  ;;  %v51_v22 = vadd.f32 %v47_v18, %v46_v17  ;;  %v58_v23 = vadd.f32 %v49_v20, %v48_v19 }
  0x10   :  { %p271_p3 = por %p270_p2, %p269_p1 }
  0x11   :  { %v52_v24 = vrot.slane %v51_v22, 4  ;;  %v59_v25 = vrot.slane %v58_v23, 4 }
  0x12   :  { %242 = vmatpush3.bf16.msra.mxu0 %v260_v21  ;;  %p272_p4 = pnand %p271_p3, %p265_p0 }
  0x13   :  { %243 = vmatprep.subr.bf16.mxu0 %v288_v1  ;;  %v53_v27 = vadd.f32 %v52_v24, %v51_v22  ;;  %v60_v28 = vadd.f32 %v59_v25, %v58_v23 }
  0x15   :  { %v54_v29 = vrot.slane %v53_v27, 2  ;;  %v61_v30 = vrot.slane %v60_v28, 2 }
  0x16   :  { %244 = vmatpush3.bf16.msra.mxu0 %v261_v26 }
  0x17   :  { %245 = vmatprep.subr.bf16.mxu0 %v288_v1  ;;  %v55_v32 = vadd.f32 %v54_v29, %v53_v27  ;;  %v62_v33 = vadd.f32 %v61_v30, %v60_v28 }
  0x19   :  { %v56_v34 = vrot.slane %v55_v32, 1  ;;  %v63_v35 = vrot.slane %v62_v33, 1 }
  0x1a   :  { %246 = vmatpush3.bf16.msra.mxu0 %v262_v31 }
  0x1b   :  { %247 = vmatprep.subr.bf16.mxu0 %v288_v1  ;;  %v57_v38 = vadd.f32 %v56_v34, %v55_v32  ;;  %v64_v39 = vadd.f32 %v63_v35, %v62_v33 }
  0x1d   :  { %v68_v40 = vsel %vm67_vm1, %v64_v39, %v57_v38 }
  0x1e   :  { %248 = vmatpush3.bf16.msra.mxu0 %v263_v36  ;;  %v70_v41 = vadd.f32 %v68_v40, %v50_v37 }
  0x20   :  { %71 = vst [vmem:[#allocation2] sm:$0x3] %v70_v41 }
  0x27   :  { %v75_v42 = vld [vmem:[#allocation2] sm:$0x3] }
  0x28   :  { %v76_v43 = vmul.f32 0.0625, %v75_v42 }
  0x2a   :  { %v77_v44 = vpack.c.bf16 %v76_v43, %v76_v43 }
  0x2c   :  { %250 = vmatmul.mubr.bf16.vlgmr.msra.gmra.mrb[0].mxu0 %v77_v44 }
  0xff   :  { %v183_v46 = vpop.f32.mrb[0].mxu0 }
 0x100   :  { %v184_v47 = vadd.f32 %v206_v45, %v183_v46  ;;  %v251_v48 = vpop.f32.mrb[1].mxu0 }
 0x101   :  { %v186_v49 = vpop.f32.mrb[2].mxu0 }
 0x102   :  { %189 = vst [vmem:[#allocation3] sm:$0x3] %v184_v47  ;;  %v252_v50 = vpop.f32.mrb[3].mxu0 }
 0x103   :  { %275 = shalt.err (!%p272_p4)
}
 0x104   :  { %s276_s3 = scalar_lea.hbm %s371_s4, 32 }
 0x105   :  { %p277_p5 = scmp.ne.s32.totalorder %s371_s4, %s276_s3  ;;  %p280_p6 = scmp.lt.u32.totalorder %s276_s3, %s371_s4 }
 0x107   :  { %p282_p7 = pnand %p280_p6, %p277_p5 }
 0x109   :  { %285 = shalt.err (!%p282_p7)
}
 0x10a   :  { %199 = dma.vmem_to_hbm [thread:$0]  %s197_s14, 32, %s371_s4, [#allocation4]  }
 0x10b   :  { %286 = dma.done.wait [#allocation4], 32  }
 0x10c   :  { %287 = vsyncadd [#allocation4], 4294967264 }
 0x10d   :  { %203 = vsyncpa [#allocation4], 1 }

</bundles_post_ra>
